<compile_context>
chip_gen: v5e
topology: v5e:2x2
jax: 0.10.0
libtpu: 0.0.40
codegen_flags: <defaults>
</compile_context>

<pallas_src>
import jax
import jax.numpy as jnp
from jax.experimental import pallas as pl
from jax.experimental.pallas import tpu as pltpu


def _elu(x):
    # ELU with alpha=1.0 (matches torch.nn.ELU default); clamp the dead branch
    # so jnp.where never sees exp-overflow.
    return jnp.where(x > 0.0, x, jnp.exp(jnp.minimum(x, 0.0)) - 1.0)


def gat_kernel(vnow_ref, vnext_ref, qf1_ref, qf2_ref, adj_ref,
               w1v_ref, w2v_ref, w3_ref, w6a_ref, w6b_ref, b6_ref, out_ref):
    bt, n, v = vnow_ref.shape
    m = w1v_ref.shape[1]
    cdt = w1v_ref.dtype  # MXU input dtype (bf16 by default, f32 optional)

    # Flatten the batch-of-graphs block so shared-weight projections feed
    # Bt*N rows into the MXU instead of N rows per graph.
    vn = vnow_ref[...].reshape(bt * n, v).astype(cdt)    # (Bt*N, V)
    vx = vnext_ref[...].reshape(bt * n, v).astype(cdt)   # (Bt*N, V)

    vfeat1 = jnp.dot(vn, w1v_ref[...], preferred_element_type=jnp.float32)  # (Bt*N, M)
    vfeat2 = jnp.dot(vn, w2v_ref[...], preferred_element_type=jnp.float32)  # (Bt*N, M)
    vx3 = jnp.dot(vx, w3_ref[...], preferred_element_type=jnp.float32)      # (Bt*N, M)

    # Condition features were projected in the wrapper; just broadcast-multiply.
    qf1 = qf1_ref[...][:, None, :]                       # (Bt, 1, M) f32
    qf2 = qf2_ref[...][:, None, :]                       # (Bt, 1, M) f32

    # ---- fusion_1 / fusion_2: ELU(visual_proj * question_proj), f32 ----
    joint1 = _elu(vfeat1.reshape(bt, n, m) * qf1)        # (Bt, N, M)
    joint2 = _elu(vfeat2.reshape(bt, n, m) * qf2)        # (Bt, N, M)

    # ---- message = W3(visual_next) @ joint1^T per graph ----
    # Contract on the last dims of both operands (MXU-friendly, no XLU transpose).
    msg = jnp.einsum('bnm,bkm->bnk',
                     vx3.reshape(bt, n, m).astype(cdt),
                     joint1.astype(cdt),
                     preferred_element_type=jnp.float32)  # (Bt, N, N)
    msg = msg * adj_ref[...]                              # multiplicative mask (as in reference)

    # ---- row softmax over neighbors (f32) ----
    msg_max = jnp.max(msg, axis=-1, keepdims=True)
    e = jnp.exp(msg - msg_max)
    row_sum = jnp.sum(e, axis=-1, keepdims=True)
    weight = e * pl.reciprocal(row_sum, approx=True)      # (Bt, N, N)

    # ---- aggregate, activate ----
    vnew = _elu(jnp.einsum('bnk,bkm->bnm',
                           weight.astype(cdt),
                           joint2.astype(cdt),
                           preferred_element_type=jnp.float32))  # (Bt, N, M)

    # ---- W6 applied to cat([visual_next, vnew]) via split weights ----
    out = (jnp.dot(vx, w6a_ref[...], preferred_element_type=jnp.float32)
           + jnp.dot(vnew.reshape(bt * n, m).astype(cdt), w6b_ref[...],
                     preferred_element_type=jnp.float32)
           + b6_ref[...])                                 # (Bt*N, V) f32
    out_ref[...] = out.reshape(bt, n, v)


def _choose_block_batch(B, N, min_rows=128):
    """Largest useful batch block: Bt*N >= min_rows, Bt | B, sublane-friendly."""
    divisors = [d for d in range(1, B + 1) if B % d == 0]
    ok = [d for d in divisors if d == B or d % 8 == 0]
    for d in ok:                       # prefer filling the MXU with >= 2 grid steps
        if d * N >= min_rows and B // d >= 2:
            return d
    for d in ok:                       # otherwise just fill the MXU
        if d * N >= min_rows:
            return d
    return ok[-1]


def gat_forward(visual_now, visual_next, condition, adj, params,
                *, block_batch=None, mxu_dtype=jnp.bfloat16):
    B, N, V = visual_now.shape
    M = params["w1q"].shape[0]
    assert condition.shape == (B, M)
    assert adj.shape == (B, N, N)

    # Hoisted condition projections: one full-width (B, M) @ (M, M) matmul each
    # instead of B single-row MXU ops inside the kernel.
    qfeat1 = jnp.dot(condition, params["w1q"], preferred_element_type=jnp.float32)
    qfeat2 = jnp.dot(condition, params["w2q"], preferred_element_type=jnp.float32)

    # Weights fed to the MXU in bf16 (halves weight DMA bytes as well).
    w1v = params["w1v"].astype(mxu_dtype)
    w2v = params["w2v"].astype(mxu_dtype)
    w3 = params["w3"].astype(mxu_dtype)
    w6 = params["w6"]                              # (V + M, V) == W6.weight.T
    w6a = w6[:V, :].astype(mxu_dtype)
    w6b = w6[V:, :].astype(mxu_dtype)
    b6 = params["b6"].reshape(1, V).astype(jnp.float32)

    Bt = block_batch if block_batch is not None else _choose_block_batch(B, N)
    assert B % Bt == 0
    grid = (B // Bt,)

    # Advisory cost estimate so XLA schedules the custom call sensibly.
    wbytes = jnp.dtype(mxu_dtype).itemsize
    flops = (2 * B * N * V * M * 3              # W1v, W2v, W3 projections
             + 2 * B * N * N * M * 2            # message + aggregation
             + 2 * B * N * (V + M) * V)         # W6
    transcendentals = 3 * B * N * M + B * N * N + B * N
    bytes_accessed = (2 * B * N * V * 4 + 2 * B * M * 4 + B * N * N * 4   # activations in
                      + (3 * V * M + V * V + M * V) * wbytes + V * 4      # weights + bias
                      + B * N * V * 4)                                    # output
    cost = pl.CostEstimate(flops=flops, transcendentals=transcendentals,
                           bytes_accessed=bytes_accessed)

    grid_spec = pltpu.PrefetchScalarGridSpec(
        num_scalar_prefetch=0,
        grid=grid,
        in_specs=[
            pl.BlockSpec((Bt, N, V), lambda b: (b, 0, 0)),   # visual_now
            pl.BlockSpec((Bt, N, V), lambda b: (b, 0, 0)),   # visual_next
            pl.BlockSpec((Bt, M), lambda b: (b, 0)),         # qfeat1
            pl.BlockSpec((Bt, M), lambda b: (b, 0)),         # qfeat2
            pl.BlockSpec((Bt, N, N), lambda b: (b, 0, 0)),   # adj
            pl.BlockSpec((V, M), lambda b: (0, 0)),          # w1v   (constant -> fetched once)
            pl.BlockSpec((V, M), lambda b: (0, 0)),          # w2v
            pl.BlockSpec((V, M), lambda b: (0, 0)),          # w3
            pl.BlockSpec((V, V), lambda b: (0, 0)),          # w6a
            pl.BlockSpec((M, V), lambda b: (0, 0)),          # w6b
            pl.BlockSpec((1, V), lambda b: (0, 0)),          # b6
        ],
        out_specs=pl.BlockSpec((Bt, N, V), lambda b: (b, 0, 0)),
    )

    return pl.pallas_call(
        gat_kernel,
        out_shape=jax.ShapeDtypeStruct((B, N, V), jnp.float32),
        grid_spec=grid_spec,
        compiler_params=pltpu.CompilerParams(
            dimension_semantics=("parallel",),
            vmem_limit_bytes=32 * 1024 * 1024),
        cost_estimate=cost,
    )(visual_now, visual_next, qfeat1, qfeat2, adj,
      w1v, w2v, w3, w6a, w6b, b6)


def init_params(key, visual_dim, module_dim):
    ks = jax.random.split(key, 7)
    scale = 0.1
    return {
        "w1v": scale * jax.random.normal(ks[0], (visual_dim, module_dim), jnp.float32),
        "w1q": scale * jax.random.normal(ks[1], (module_dim, module_dim), jnp.float32),
        "w2v": scale * jax.random.normal(ks[2], (visual_dim, module_dim), jnp.float32),
        "w2q": scale * jax.random.normal(ks[3], (module_dim, module_dim), jnp.float32),
        "w3":  scale * jax.random.normal(ks[4], (visual_dim, module_dim), jnp.float32),
        "w6":  scale * jax.random.normal(ks[5], (visual_dim + module_dim, visual_dim), jnp.float32),
        "b6":  scale * jax.random.normal(ks[6], (visual_dim,), jnp.float32),
    }


if __name__ == "__main__":
    # Small but MXU/lane-friendly demo shapes: B*N fills 128 MXU rows per
    # block (Bt=16 -> grid of 2 blocks), and V=M=128 keeps loads/stores
    # lane-dense (no masked partial stores).
    B, N = 32, 8                       # batch (graphs), nodes per graph
    visual_dim, module_dim = 128, 128

    key = jax.random.PRNGKey(0)
    k_vn, k_vx, k_c, k_a, k_p = jax.random.split(key, 5)

    visual_now = jax.random.normal(k_vn, (B, N, visual_dim), jnp.float32)
    visual_next = jax.random.normal(k_vx, (B, N, visual_dim), jnp.float32)
    condition = jax.random.normal(k_c, (B, module_dim), jnp.float32)
    adj = (jax.random.uniform(k_a, (B, N, N)) > 0.5).astype(jnp.float32)

    params = init_params(k_p, visual_dim, module_dim)

    out = jax.jit(gat_forward)(visual_now, visual_next, condition, adj, params)
    out = jax.block_until_ready(out)
    assert out.shape == (B, N, visual_dim)
    assert bool(jnp.all(jnp.isfinite(out)))
    print("KERNEL_OK")
</pallas_src>

<mosaic_0001>
module attributes {stable_mosaic.version = 11 : i64} {
  func.func @gat_kernel(%arg0: i32, %arg1: memref<16x8x128xf32, #tpu.memory_space<vmem>>, %arg2: memref<16x8x128xf32, #tpu.memory_space<vmem>>, %arg3: memref<16x128xf32, #tpu.memory_space<vmem>>, %arg4: memref<16x128xf32, #tpu.memory_space<vmem>>, %arg5: memref<16x8x8xf32, #tpu.memory_space<vmem>>, %arg6: memref<128x128xbf16, #tpu.memory_space<vmem>>, %arg7: memref<128x128xbf16, #tpu.memory_space<vmem>>, %arg8: memref<128x128xbf16, #tpu.memory_space<vmem>>, %arg9: memref<128x128xbf16, #tpu.memory_space<vmem>>, %arg10: memref<128x128xbf16, #tpu.memory_space<vmem>>, %arg11: memref<1x128xf32, #tpu.memory_space<vmem>>, %arg12: memref<16x8x128xf32, #tpu.memory_space<vmem>>) attributes {dimension_semantics = [#tpu.dimension_semantics<parallel>], iteration_bounds = array<i64: 2>, scalar_prefetch = 0 : i64, scratch_operands = 0 : i64, tpu.core_type = #tpu.core_type<tc>, window_params = [{transform_indices = @transform_0, window_bounds = array<i64: 16, 8, 128>}, {transform_indices = @transform_1, window_bounds = array<i64: 16, 8, 128>}, {transform_indices = @transform_2, window_bounds = array<i64: 16, 128>}, {transform_indices = @transform_3, window_bounds = array<i64: 16, 128>}, {transform_indices = @transform_4, window_bounds = array<i64: 16, 8, 8>}, {pipeline_mode = #tpu.pipeline_mode<synchronous>, transform_indices = @transform_5, window_bounds = array<i64: 128, 128>}, {pipeline_mode = #tpu.pipeline_mode<synchronous>, transform_indices = @transform_6, window_bounds = array<i64: 128, 128>}, {pipeline_mode = #tpu.pipeline_mode<synchronous>, transform_indices = @transform_7, window_bounds = array<i64: 128, 128>}, {pipeline_mode = #tpu.pipeline_mode<synchronous>, transform_indices = @transform_8, window_bounds = array<i64: 128, 128>}, {pipeline_mode = #tpu.pipeline_mode<synchronous>, transform_indices = @transform_9, window_bounds = array<i64: 128, 128>}, {pipeline_mode = #tpu.pipeline_mode<synchronous>, transform_indices = @transform_10, window_bounds = array<i64: 1, 128>}, {transform_indices = @transform_11, window_bounds = array<i64: 16, 8, 128>}]} {
    %c0 = arith.constant 0 : index
    %c0_0 = arith.constant 0 : index
    %c0_1 = arith.constant 0 : index
    %0 = vector.load %arg1[%c0, %c0_0, %c0_1] : memref<16x8x128xf32, #tpu.memory_space<vmem>>, vector<16x8x128xf32>
    %1 = vector.shape_cast %0 : vector<16x8x128xf32> to vector<128x128xf32>
    %2 = arith.truncf %1 : vector<128x128xf32> to vector<128x128xbf16>
    %c0_2 = arith.constant 0 : index
    %c0_3 = arith.constant 0 : index
    %c0_4 = arith.constant 0 : index
    %3 = vector.load %arg2[%c0_2, %c0_3, %c0_4] : memref<16x8x128xf32, #tpu.memory_space<vmem>>, vector<16x8x128xf32>
    %4 = vector.shape_cast %3 : vector<16x8x128xf32> to vector<128x128xf32>
    %5 = arith.truncf %4 : vector<128x128xf32> to vector<128x128xbf16>
    %c0_5 = arith.constant 0 : index
    %c0_6 = arith.constant 0 : index
    %6 = vector.load %arg6[%c0_5, %c0_6] : memref<128x128xbf16, #tpu.memory_space<vmem>>, vector<128x128xbf16>
    %cst = arith.constant dense<0.000000e+00> : vector<128x128xf32>
    %7 = tpu.matmul %2, %6, %cst {dimension_numbers = #tpu.dot_dimension_numbers<[1], [0], [0], [1], [0, 0, 1, 1], [], []>} : vector<128x128xbf16>, vector<128x128xbf16>, vector<128x128xf32> -> vector<128x128xf32>
    %c0_7 = arith.constant 0 : index
    %c0_8 = arith.constant 0 : index
    %8 = vector.load %arg7[%c0_7, %c0_8] : memref<128x128xbf16, #tpu.memory_space<vmem>>, vector<128x128xbf16>
    %cst_9 = arith.constant dense<0.000000e+00> : vector<128x128xf32>
    %9 = tpu.matmul %2, %8, %cst_9 {dimension_numbers = #tpu.dot_dimension_numbers<[1], [0], [0], [1], [0, 0, 1, 1], [], []>} : vector<128x128xbf16>, vector<128x128xbf16>, vector<128x128xf32> -> vector<128x128xf32>
    %c0_10 = arith.constant 0 : index
    %c0_11 = arith.constant 0 : index
    %10 = vector.load %arg8[%c0_10, %c0_11] : memref<128x128xbf16, #tpu.memory_space<vmem>>, vector<128x128xbf16>
    %cst_12 = arith.constant dense<0.000000e+00> : vector<128x128xf32>
    %11 = tpu.matmul %5, %10, %cst_12 {dimension_numbers = #tpu.dot_dimension_numbers<[1], [0], [0], [1], [0, 0, 1, 1], [], []>} : vector<128x128xbf16>, vector<128x128xbf16>, vector<128x128xf32> -> vector<128x128xf32>
    %c0_13 = arith.constant 0 : index
    %c0_14 = arith.constant 0 : index
    %12 = vector.load %arg3[%c0_13, %c0_14] : memref<16x128xf32, #tpu.memory_space<vmem>>, vector<16x128xf32>
    %13 = vector.shape_cast %12 : vector<16x128xf32> to vector<16x1x128xf32>
    %c0_15 = arith.constant 0 : index
    %c0_16 = arith.constant 0 : index
    %14 = vector.load %arg4[%c0_15, %c0_16] : memref<16x128xf32, #tpu.memory_space<vmem>>, vector<16x128xf32>
    %15 = vector.shape_cast %14 : vector<16x128xf32> to vector<16x1x128xf32>
    %16 = vector.shape_cast %7 : vector<128x128xf32> to vector<16x8x128xf32>
    %17 = vector.broadcast %13 : vector<16x1x128xf32> to vector<16x8x128xf32>
    %18 = arith.mulf %16, %17 : vector<16x8x128xf32>
    %cst_17 = arith.constant 0.000000e+00 : f32
    %19 = vector.broadcast %cst_17 : f32 to vector<16x8x128xf32>
    %20 = arith.cmpf ogt, %18, %19 : vector<16x8x128xf32>
    %cst_18 = arith.constant 0.000000e+00 : f32
    %21 = vector.broadcast %cst_18 : f32 to vector<16x8x128xf32>
    %22 = arith.minimumf %18, %21 : vector<16x8x128xf32>
    %23 = math.exp %22 : vector<16x8x128xf32>
    %cst_19 = arith.constant 1.000000e+00 : f32
    %24 = vector.broadcast %cst_19 : f32 to vector<16x8x128xf32>
    %25 = arith.subf %23, %24 : vector<16x8x128xf32>
    %26 = arith.select %20, %18, %25 : vector<16x8x128xi1>, vector<16x8x128xf32>
    %27 = vector.shape_cast %9 : vector<128x128xf32> to vector<16x8x128xf32>
    %28 = vector.broadcast %15 : vector<16x1x128xf32> to vector<16x8x128xf32>
    %29 = arith.mulf %27, %28 : vector<16x8x128xf32>
    %cst_20 = arith.constant 0.000000e+00 : f32
    %30 = vector.broadcast %cst_20 : f32 to vector<16x8x128xf32>
    %31 = arith.cmpf ogt, %29, %30 : vector<16x8x128xf32>
    %cst_21 = arith.constant 0.000000e+00 : f32
    %32 = vector.broadcast %cst_21 : f32 to vector<16x8x128xf32>
    %33 = arith.minimumf %29, %32 : vector<16x8x128xf32>
    %34 = math.exp %33 : vector<16x8x128xf32>
    %cst_22 = arith.constant 1.000000e+00 : f32
    %35 = vector.broadcast %cst_22 : f32 to vector<16x8x128xf32>
    %36 = arith.subf %34, %35 : vector<16x8x128xf32>
    %37 = arith.select %31, %29, %36 : vector<16x8x128xi1>, vector<16x8x128xf32>
    %38 = vector.shape_cast %11 : vector<128x128xf32> to vector<16x8x128xf32>
    %39 = arith.truncf %38 : vector<16x8x128xf32> to vector<16x8x128xbf16>
    %40 = arith.truncf %26 : vector<16x8x128xf32> to vector<16x8x128xbf16>
    "tpu.trace_start"() <{level = 10 : i32, message = "bnm,bkm->bnk"}> : () -> ()
    %cst_23 = arith.constant dense<0.000000e+00> : vector<16x8x8xf32>
    %41 = tpu.matmul %39, %40, %cst_23 {dimension_numbers = #tpu.dot_dimension_numbers<[2], [2], [1], [1], [0, 0, 0, 1, 1, 1], [0], [0]>} : vector<16x8x128xbf16>, vector<16x8x128xbf16>, vector<16x8x8xf32> -> vector<16x8x8xf32>
    "tpu.trace_stop"() : () -> ()
    %c0_24 = arith.constant 0 : index
    %c0_25 = arith.constant 0 : index
    %c0_26 = arith.constant 0 : index
    %42 = vector.load %arg5[%c0_24, %c0_25, %c0_26] : memref<16x8x8xf32, #tpu.memory_space<vmem>>, vector<16x8x8xf32>
    %43 = arith.mulf %41, %42 : vector<16x8x8xf32>
    %cst_27 = arith.constant dense<0xFF800000> : vector<16x8xf32>
    %44 = vector.multi_reduction <maximumf>, %43, %cst_27 [2] : vector<16x8x8xf32> to vector<16x8xf32>
    %45 = vector.shape_cast %44 : vector<16x8xf32> to vector<16x8x1xf32>
    %46 = vector.broadcast %45 : vector<16x8x1xf32> to vector<16x8x8xf32>
    %47 = arith.subf %43, %46 : vector<16x8x8xf32>
    %48 = math.exp %47 : vector<16x8x8xf32>
    %cst_28 = arith.constant dense<0.000000e+00> : vector<16x8xf32>
    %49 = vector.multi_reduction <add>, %48, %cst_28 [2] : vector<16x8x8xf32> to vector<16x8xf32>
    %50 = vector.shape_cast %49 : vector<16x8xf32> to vector<16x8x1xf32>
    %51 = tpu.reciprocal %50 {approx = true} : vector<16x8x1xf32> -> vector<16x8x1xf32>
    %52 = vector.broadcast %51 : vector<16x8x1xf32> to vector<16x8x8xf32>
    %53 = arith.mulf %48, %52 : vector<16x8x8xf32>
    %54 = arith.truncf %53 : vector<16x8x8xf32> to vector<16x8x8xbf16>
    %55 = arith.truncf %37 : vector<16x8x128xf32> to vector<16x8x128xbf16>
    "tpu.trace_start"() <{level = 10 : i32, message = "bnk,bkm->bnm"}> : () -> ()
    %cst_29 = arith.constant dense<0.000000e+00> : vector<16x8x128xf32>
    %56 = tpu.matmul %54, %55, %cst_29 {dimension_numbers = #tpu.dot_dimension_numbers<[2], [1], [1], [2], [0, 0, 0, 1, 1, 2], [0], [0]>} : vector<16x8x8xbf16>, vector<16x8x128xbf16>, vector<16x8x128xf32> -> vector<16x8x128xf32>
    %cst_30 = arith.constant 0.000000e+00 : f32
    "tpu.trace_stop"() : () -> ()
    %57 = vector.broadcast %cst_30 : f32 to vector<16x8x128xf32>
    %58 = arith.cmpf ogt, %56, %57 : vector<16x8x128xf32>
    %cst_31 = arith.constant 0.000000e+00 : f32
    %59 = vector.broadcast %cst_31 : f32 to vector<16x8x128xf32>
    %60 = arith.minimumf %56, %59 : vector<16x8x128xf32>
    %61 = math.exp %60 : vector<16x8x128xf32>
    %cst_32 = arith.constant 1.000000e+00 : f32
    %62 = vector.broadcast %cst_32 : f32 to vector<16x8x128xf32>
    %63 = arith.subf %61, %62 : vector<16x8x128xf32>
    %64 = arith.select %58, %56, %63 : vector<16x8x128xi1>, vector<16x8x128xf32>
    %c0_33 = arith.constant 0 : index
    %c0_34 = arith.constant 0 : index
    %65 = vector.load %arg9[%c0_33, %c0_34] : memref<128x128xbf16, #tpu.memory_space<vmem>>, vector<128x128xbf16>
    %cst_35 = arith.constant dense<0.000000e+00> : vector<128x128xf32>
    %66 = tpu.matmul %5, %65, %cst_35 {dimension_numbers = #tpu.dot_dimension_numbers<[1], [0], [0], [1], [0, 0, 1, 1], [], []>} : vector<128x128xbf16>, vector<128x128xbf16>, vector<128x128xf32> -> vector<128x128xf32>
    %67 = vector.shape_cast %64 : vector<16x8x128xf32> to vector<128x128xf32>
    %68 = arith.truncf %67 : vector<128x128xf32> to vector<128x128xbf16>
    %c0_36 = arith.constant 0 : index
    %c0_37 = arith.constant 0 : index
    %69 = vector.load %arg10[%c0_36, %c0_37] : memref<128x128xbf16, #tpu.memory_space<vmem>>, vector<128x128xbf16>
    %cst_38 = arith.constant dense<0.000000e+00> : vector<128x128xf32>
    %70 = tpu.matmul %68, %69, %cst_38 {dimension_numbers = #tpu.dot_dimension_numbers<[1], [0], [0], [1], [0, 0, 1, 1], [], []>} : vector<128x128xbf16>, vector<128x128xbf16>, vector<128x128xf32> -> vector<128x128xf32>
    %71 = arith.addf %66, %70 : vector<128x128xf32>
    %c0_39 = arith.constant 0 : index
    %c0_40 = arith.constant 0 : index
    %72 = vector.load %arg11[%c0_39, %c0_40] : memref<1x128xf32, #tpu.memory_space<vmem>>, vector<1x128xf32>
    %73 = vector.broadcast %72 : vector<1x128xf32> to vector<128x128xf32>
    %74 = arith.addf %71, %73 : vector<128x128xf32>
    %75 = vector.shape_cast %74 : vector<128x128xf32> to vector<16x8x128xf32>
    %c0_41 = arith.constant 0 : index
    %c0_42 = arith.constant 0 : index
    %c0_43 = arith.constant 0 : index
    %76 = vector.load %arg12[%c0_41, %c0_42, %c0_43] : memref<16x8x128xf32, #tpu.memory_space<vmem>>, vector<16x8x128xf32>
    tpu.vector_store %arg12[%c0_41, %c0_42, %c0_43], %75 {strides = array<i32>} : memref<16x8x128xf32, #tpu.memory_space<vmem>>, vector<16x8x128xf32>,
    return
  }
  func.func @transform_0(%arg0: i32) -> (i32, i32, i32) {
    %c0_i32 = arith.constant 0 : i32
    %c0_i32_0 = arith.constant 0 : i32
    %c0_i32_1 = arith.constant 0 : i32
    return %arg0, %c0_i32, %c0_i32_0 : i32, i32, i32
  }
  func.func @transform_1(%arg0: i32) -> (i32, i32, i32) {
    %c0_i32 = arith.constant 0 : i32
    %c0_i32_0 = arith.constant 0 : i32
    %c0_i32_1 = arith.constant 0 : i32
    return %arg0, %c0_i32, %c0_i32_0 : i32, i32, i32
  }
  func.func @transform_2(%arg0: i32) -> (i32, i32) {
    %c0_i32 = arith.constant 0 : i32
    %c0_i32_0 = arith.constant 0 : i32
    return %arg0, %c0_i32 : i32, i32
  }
  func.func @transform_3(%arg0: i32) -> (i32, i32) {
    %c0_i32 = arith.constant 0 : i32
    %c0_i32_0 = arith.constant 0 : i32
    return %arg0, %c0_i32 : i32, i32
  }
  func.func @transform_4(%arg0: i32) -> (i32, i32, i32) {
    %c0_i32 = arith.constant 0 : i32
    %c0_i32_0 = arith.constant 0 : i32
    %c0_i32_1 = arith.constant 0 : i32
    return %arg0, %c0_i32, %c0_i32_0 : i32, i32, i32
  }
  func.func @transform_5(%arg0: i32) -> (i32, i32) {
    %c0_i32 = arith.constant 0 : i32
    %c0_i32_0 = arith.constant 0 : i32
    %c0_i32_1 = arith.constant 0 : i32
    return %c0_i32, %c0_i32_0 : i32, i32
  }
  func.func @transform_6(%arg0: i32) -> (i32, i32) {
    %c0_i32 = arith.constant 0 : i32
    %c0_i32_0 = arith.constant 0 : i32
    %c0_i32_1 = arith.constant 0 : i32
    return %c0_i32, %c0_i32_0 : i32, i32
  }
  func.func @transform_7(%arg0: i32) -> (i32, i32) {
    %c0_i32 = arith.constant 0 : i32
    %c0_i32_0 = arith.constant 0 : i32
    %c0_i32_1 = arith.constant 0 : i32
    return %c0_i32, %c0_i32_0 : i32, i32
  }
  func.func @transform_8(%arg0: i32) -> (i32, i32) {
    %c0_i32 = arith.constant 0 : i32
    %c0_i32_0 = arith.constant 0 : i32
    %c0_i32_1 = arith.constant 0 : i32
    return %c0_i32, %c0_i32_0 : i32, i32
  }
  func.func @transform_9(%arg0: i32) -> (i32, i32) {
    %c0_i32 = arith.constant 0 : i32
    %c0_i32_0 = arith.constant 0 : i32
    %c0_i32_1 = arith.constant 0 : i32
    return %c0_i32, %c0_i32_0 : i32, i32
  }
  func.func @transform_10(%arg0: i32) -> (i32, i32) {
    %c0_i32 = arith.constant 0 : i32
    %c0_i32_0 = arith.constant 0 : i32
    %c0_i32_1 = arith.constant 0 : i32
    return %c0_i32, %c0_i32_0 : i32, i32
  }
  func.func @transform_11(%arg0: i32) -> (i32, i32, i32) {
    %c0_i32 = arith.constant 0 : i32
    %c0_i32_0 = arith.constant 0 : i32
    %c0_i32_1 = arith.constant 0 : i32
    return %arg0, %c0_i32, %c0_i32_0 : i32, i32, i32
  }
}

</mosaic_0001>

<bundles_post_ra>
// kernel: gat_forward.1
= control target key start
LH: loop header
LB: loop body
LE: loop exit
PB: predicated region body
PF: predicated region fallthrough
CT: control target
= control target key end

     0   :  { %16 = vsyncpa [#allocation3], 0  ;;  %s3844_s0 = inlined_call_operand.vmem [shape: f32[32,8,128], index: 0, kind: input, shape index: {}]   ;;  %s3845_s1 = inlined_call_operand.vmem [shape: f32[32,8,128], index: 1, kind: input, shape index: {}]   ;;  %s3846_s2 = inlined_call_operand.vmem [shape: f32[32,128], index: 2, kind: input, shape index: {}]   ;;  %s3847_s3 = inlined_call_operand.vmem [shape: f32[32,128], index: 3, kind: input, shape index: {}]   ;;  %s3848_s4 = inlined_call_operand.vmem [shape: f32[32,8,8], index: 4, kind: input, shape index: {}]   ;;  %s3849_s5 = inlined_call_operand.vmem [shape: bf16[128,128], index: 5, kind: input, shape index: {}]   ;;  %s3850_s6 = inlined_call_operand.vmem [shape: bf16[128,128], index: 6, kind: input, shape index: {}]   ;;  %s3851_s7 = inlined_call_operand.vmem [shape: bf16[128,128], index: 7, kind: input, shape index: {}]   ;;  %s3852_s8 = inlined_call_operand.vmem [shape: bf16[128,128], index: 8, kind: input, shape index: {}]   ;;  %s3853_s9 = inlined_call_operand.vmem [shape: bf16[128,128], index: 9, kind: input, shape index: {}]   ;;  %s3854_s10 = inlined_call_operand.vmem [shape: f32[1,128], index: 10, kind: input, shape index: {}]   ;;  %s3855_s11 = inlined_call_operand.hbm [shape: f32[32,8,128], index: 11, kind: output, shape index: {}]  }
   0x1   :  { %18 = vsyncpa [#allocation3 + $0x1], 0  ;;  %s3095_s17 = smov 0   ;;  %s3097_s18 = smov 0  }
   0x2   :  { %s3099_s19 = smov 0   ;;  %s3101_s20 = smov 0  }
   0x3 LB: > { %s3116_s21 = sadd.s32 4294967295, %s3031_s20   ;;  %s2466_s22 = sadd.s32 4294967294, %s3031_s20   ;;  %s3031_s20 = sphi %s3101_s20, %s3866_s20   ;;  %s3027_s19 = sphi %s3099_s19, %s3865_s19   ;;  %s3023_s18 = sphi %s3097_s18, %s3864_s18   ;;  %s3019_s17 = sphi %s3095_s17, %s3863_s17  }
   0x4   : > { %s3120_s23 = sadd.s32 1, %s3031_s20   ;;  %s287_s24 = sadd.s32 1, %s3027_s19 }
   0x5   : > { %s284_s25 = ssub.s32 %s3031_s20, %s3120_s23  ;;  %p297_p0 = scmp.ne.s32.totalorder %s3027_s19, %s3023_s18 }
   0x6   : > { %p285_p1 = scmp.eq.s32.totalorder %s284_s25, 0  ;;  %p298_p2 = scmp.eq.s32.totalorder %s3116_s21, 1 }
   0x7   : > { %p303_p3 = scmp.ne.s32.totalorder %s3023_s18, %s3019_s17  ;;  %p304_p4 = scmp.eq.s32.totalorder %s2466_s22, 1 }
   0x8   : > { %s3131_s26 = scalar_select %p285_p1, %s3027_s19, %s287_s24  }
   0x9   : > { %p3133_p5 = por %p298_p2, %p297_p0  ;;  %p3137_p6 = por %p304_p4, %p303_p3 }
   0xa   : > { %3857 = sst [smem:[#allocation5_spill]] %s3131_s26  ;;  %p2469_p7 = scmp.ge.s32.totalorder %s3031_s20, 1 }
   0xb   : > { %p385_p8 = scmp.lt.s32.totalorder %s3031_s20, 3 }
   0xd   : > { %p386_p9 = pnand %p2469_p7, %p385_p8 }
   0xf   : > { %389 = sbr.rel (%p386_p9) target bundleno = 1277 (0x4fd), region = 64 }
  0x14   : > { %v2717_v0 = vld [vmem:[%s3849_s5 + $0x38] sm:$0xff]  ;;  %v2716_v2 = vld [vmem:[%s3849_s5 + $0x30] sm:$0xff]  ;;  %v2715_v5 = vld [vmem:[%s3849_s5 + $0x28] sm:$0xff]  ;;  %s2471_s14 = sshll.u32 %s3116_s21, 4  ;;  %vm1672_vm6 = vcmask 1043456   ;;  %s2989_s26 = scalar_lea.hbm %s3855_s11, 256 }
  0x15   : > { %v2725_v1 = vld [vmem:[%s3850_s6 + $0x38] sm:$0xff]  ;;  %589 = vmatpush.bf16.msra.mxu0 %v2717_v0  ;;  %v2724_v3 = vld [vmem:[%s3850_s6 + $0x30] sm:$0xff]  ;;  %v2723_v6 = vld [vmem:[%s3850_s6 + $0x28] sm:$0xff]  ;;  %p446_p10 = scmp.lt.s32.totalorder %s2471_s14, 31 }
  0x16   : > { %702 = vmatpush.bf16.msra.mxu1 %v2725_v1  ;;  %v2733_v4 = vld [vmem:[%s3851_s7 + $0x38] sm:$0xff]  ;;  %v2714_v7 = vld [vmem:[%s3849_s5 + $0x20] sm:$0xff]  ;;  %v2732_v11 = vld [vmem:[%s3851_s7 + $0x30] sm:$0xff] }
  0x17   : > { %2751 = vmatpush.bf16.msra.mxu2 %v2733_v4  ;;  %v2722_v8 = vld [vmem:[%s3850_s6 + $0x20] sm:$0xff]  ;;  %v2713_v9 = vld [vmem:[%s3849_s5 + $0x18] sm:$0xff]  ;;  %s3868_s14 = smov (!%p446_p10, %s2471_s14), 31  ;;  %v2712_v12 = vld [vmem:[%s3849_s5 + $0x10] sm:$0xff] }
  0x18   : > { %v2721_v10 = vld [vmem:[%s3850_s6 + $0x18] sm:$0xff]  ;;  %v2720_v13 = vld [vmem:[%s3850_s6 + $0x10] sm:$0xff]  ;;  %s3186_s25 = sshll.u32 %s3868_s14, 3  ;;  %v2711_v14 = vld [vmem:[%s3849_s5 + $0x8] sm:$0xff] }
  0x19   : > { %590 = vmatpush.bf16.msra.mxu0 %v2716_v2  ;;  %v2719_v15 = vld [vmem:[%s3850_s6 + $0x8] sm:$0xff]  ;;  %s3198_s16 = scalar_lea.vmem %s3844_s0, %s3186_s25  ;;  %v2710_v16 = vld [vmem:[%s3849_s5] sm:$0xff]  ;;  %v2729_v26 = vld [vmem:[%s3851_s7 + $0x18] sm:$0xff]  ;;  %s3234_s22 = scalar_lea.vmem %s3845_s1, %s3186_s25 }
  0x1a   : > { %703 = vmatpush.bf16.msra.mxu1 %v2724_v3  ;;  %v2718_v17 = vld [vmem:[%s3850_s6] sm:$0xff]  ;;  %v478_v19 = vld [vmem:[%s3198_s16 + $0x8] sm:$0xff]  ;;  %v479_v23 = vld [vmem:[%s3198_s16 + $0x10] sm:$0xff] }
  0x1b   : > { %2752 = vmatpush.bf16.msra.mxu2 %v2732_v11  ;;  %v477_v18 = vld [vmem:[%s3198_s16] sm:$0xff]  ;;  %v2731_v21 = vld [vmem:[%s3851_s7 + $0x28] sm:$0xff]  ;;  %v480_v24 = vld [vmem:[%s3198_s16 + $0x18] sm:$0xff] }
  0x1c   : > { %v493_v20 = vpack.c.bf16 %v478_v19, %v477_v18  ;;  %v2730_v22 = vld [vmem:[%s3851_s7 + $0x20] sm:$0xff]  ;;  %v494_v25 = vpack.c.bf16 %v480_v24, %v479_v23  ;;  %v2728_v27 = vld [vmem:[%s3851_s7 + $0x10] sm:$0xff]  ;;  %v2727_v28 = vld [vmem:[%s3851_s7 + $0x8] sm:$0xff] }
  0x1d   : > { %591 = vmatpush.bf16.msra.mxu0 %v2715_v5  ;;  %v481_v29 = vld [vmem:[%s3198_s16 + $0x20] sm:$0xff]  ;;  %v482_v30 = vld [vmem:[%s3198_s16 + $0x28] sm:$0xff]  ;;  %v507_v33 = vld [vmem:[%s3234_s22 + $0x30] sm:$0xff] }
  0x1e   : > { %704 = vmatpush.bf16.msra.mxu1 %v2723_v6  ;;  %v2726_v31 = vld [vmem:[%s3851_s7] sm:$0xff]  ;;  %v495_v32 = vpack.c.bf16 %v482_v30, %v481_v29  ;;  %v508_v34 = vld [vmem:[%s3234_s22 + $0x38] sm:$0xff]  ;;  %v483_v36 = vld [vmem:[%s3198_s16 + $0x30] sm:$0xff] }
  0x1f   : > { %2753 = vmatpush.bf16.msra.mxu2 %v2731_v21  ;;  %v3238_v35 = vpack.c.bf16 %v508_v34, %v507_v33  ;;  %v484_v37 = vld [vmem:[%s3198_s16 + $0x38] sm:$0xff]  ;;  %v509_v39 = vld [vmem:[%s3234_s22 + $0x40] sm:$0xff]  ;;  %v510_v40 = vld [vmem:[%s3234_s22 + $0x48] sm:$0xff] }
  0x20   : > { %v496_v38 = vpack.c.bf16 %v484_v37, %v483_v36  ;;  %v3245_v41 = vpack.c.bf16 %v510_v40, %v509_v39  ;;  %v485_v42 = vld [vmem:[%s3198_s16 + $0x40] sm:$0xff]  ;;  %v486_v43 = vld [vmem:[%s3198_s16 + $0x48] sm:$0xff]  ;;  %v511_v45 = vld [vmem:[%s3234_s22 + $0x50] sm:$0xff] }
  0x21   : > { %592 = vmatpush.bf16.msra.mxu0 %v2714_v7  ;;  %3860 = vst [vmem:[#allocation6_spill] sm:$0xff] %v3238_v35  ;;  %v497_v44 = vpack.c.bf16 %v486_v43, %v485_v42  ;;  %v512_v46 = vld [vmem:[%s3234_s22 + $0x58] sm:$0xff]  ;;  %v487_v48 = vld [vmem:[%s3198_s16 + $0x50] sm:$0xff]  ;;  %v513_v51 = vld [vmem:[%s3234_s22 + $0x60] sm:$0xff] }
  0x22   : > { %705 = vmatpush.bf16.msra.mxu1 %v2722_v8  ;;  %v3252_v47 = vpack.c.bf16 %v512_v46, %v511_v45  ;;  %v488_v49 = vld [vmem:[%s3198_s16 + $0x58] sm:$0xff]  ;;  %v514_v52 = vld [vmem:[%s3234_s22 + $0x68] sm:$0xff]  ;;  %v489_v54 = vld [vmem:[%s3198_s16 + $0x60] sm:$0xff] }
  0x23   : > { %2754 = vmatpush.bf16.msra.mxu2 %v2730_v22  ;;  %v498_v50 = vpack.c.bf16 %v488_v49, %v487_v48  ;;  %v3259_v53 = vpack.c.bf16 %v514_v52, %v513_v51  ;;  %v490_v55 = vld [vmem:[%s3198_s16 + $0x68] sm:$0xff]  ;;  %v515_v57 = vld [vmem:[%s3234_s22 + $0x70] sm:$0xff]  ;;  %v516_v58 = vld [vmem:[%s3234_s22 + $0x78] sm:$0xff] }
  0x24   : > { %v499_v56 = vpack.c.bf16 %v490_v55, %v489_v54  ;;  %v3266_v59 = vpack.c.bf16 %v516_v58, %v515_v57  ;;  %v491_v60 = vld [vmem:[%s3198_s16 + $0x70] sm:$0xff]  ;;  %v492_v61 = vld [vmem:[%s3198_s16 + $0x78] sm:$0xff]  ;;  %v501_v63 = vld [vmem:[%s3234_s22] sm:$0xff]  ;;  %s2475_s16 = sshll.u32 %s3116_s21, 1 }
  0x25   : > { %593 = vmatpush.bf16.msra.mxu0 %v2713_v9  ;;  %v500_v62 = vpack.c.bf16 %v492_v61, %v491_v60  ;;  %v502_v0 = vld [vmem:[%s3234_s22 + $0x8] sm:$0xff]  ;;  %v503_v6 = vld [vmem:[%s3234_s22 + $0x10] sm:$0xff]  ;;  %v504_v7 = vld [vmem:[%s3234_s22 + $0x18] sm:$0xff]  ;;  %p458_p11 = scmp.lt.s32.totalorder %s2475_s16, 3 }
  0x26   : > { %706 = vmatpush.bf16.msra.mxu1 %v2721_v10  ;;  %v3273_v1 = vpack.c.bf16 %v502_v0, %v501_v63  ;;  %v3282_v8 = vpack.c.bf16 %v504_v7, %v503_v6 }
  0x27   : > { %2755 = vmatpush.bf16.msra.mxu2 %v2729_v26  ;;  %s3870_s16 = smov (!%p458_p11, %s2475_s16), 3 }
  0x28   : > { %s2476_s24 = sshll.u32 %s3870_s16, 3  ;;  %s3475_s16 = scalar_lea.vmem %s3848_s4, %s3186_s25 }
  0x29   : > { %594 = vmatpush.bf16.msra.mxu0 %v2712_v12  ;;  %s461_s30 = scalar_lea.vmem %s3846_s2, %s2476_s24  ;;  %s3341_s13 = scalar_lea.vmem %s3847_s3, %s2476_s24 }
  0x2a   : > { %707 = vmatpush.bf16.msra.mxu1 %v2720_v13  ;;  %v3329_v34 = vld [vmem:[%s461_s30 + $0x8] sm:$0xff]  ;;  %v3349_v51 = vld [vmem:[%s3341_s13] sm:$0xff] }
  0x2b   : > { %2756 = vmatpush.bf16.msra.mxu2 %v2728_v27  ;;  %v908_v37 = vperm.slane %v3329_v34, 0  ;;  %v876_v49 = vrot.slane %v3329_v34, 2 }
  0x2d   : > { %595 = vmatpush.bf16.msra.mxu0 %v2711_v14  ;;  %v910_v54 = vperm.slane %v876_v49, 0 }
  0x2e   : > { %708 = vmatpush.bf16.msra.mxu1 %v2719_v15  ;;  %v505_v15 = vld [vmem:[%s3234_s22 + $0x20] sm:$0xff] }
  0x2f   : > { %2757 = vmatpush.bf16.msra.mxu2 %v2727_v28 }
  0x31   : > { %596 = vmatpush.bf16.msra.mxu0 %v2710_v16  ;;  %v506_v16 = vld [vmem:[%s3234_s22 + $0x28] sm:$0xff] }
  0x32   : > { %709 = vmatpush.bf16.msra.mxu1 %v2718_v17  ;;  %v3300_v17 = vpack.c.bf16 %v506_v16, %v505_v15 }
  0x33   : > { %2758 = vmatpush.bf16.msra.mxu2 %v2726_v31 }
  0x34   : > { %597 = vmatmul.bf16.vlgmr.msra.gmra.mxu0 %v493_v20 }
  0x35   : > { %710 = vmatmul.bf16.vlgmr.msra.gmra.mxu1 %v493_v20  ;;  %v3313_v20 = vld [vmem:[%s461_s30] sm:$0xff]  ;;  %s2750_s30 = sshll.u32 %s3116_s21, 7 }
  0x36   : > { %815 = vmatpush.bf16.msrb.mxu1 %v2733_v4  ;;  %838 = vmatmul.bf16.vlgmr.msra.gmra.mxu2 %v3238_v35  ;;  %v900_v24 = vperm.slane %v3313_v20, 0 }
  0x3a   : > { %816 = vmatpush.bf16.msrb.mxu1 %v2732_v11 }
  0x3e   : > { %817 = vmatpush.bf16.msrb.mxu1 %v2731_v21  ;;  %v868_v21 = vrot.slane %v3313_v20, 1 }
  0x42   : > { %818 = vmatpush.bf16.msrb.mxu1 %v2730_v22 }
  0x44   : > { %602 = vmatmul.bf16.gmra.mxu0 %v494_v25 }
  0x45   : > { %715 = vmatmul.bf16.gmra.mxu1 %v494_v25 }
  0x46   : > { %819 = vmatpush.bf16.msrb.mxu1 %v2729_v26  ;;  %843 = vmatmul.bf16.gmra.mxu2 %v3245_v41  ;;  %v901_v26 = vperm.slane %v868_v21, 0 }
  0x4a   : > { %820 = vmatpush.bf16.msrb.mxu1 %v2728_v27 }
  0x4e   : > { %821 = vmatpush.bf16.msrb.mxu1 %v2727_v28 }
  0x52   : > { %822 = vmatpush.bf16.msrb.mxu1 %v2726_v31 }
  0x54   : > { %607 = vmatmul.bf16.gmra.mxu0 %v495_v32 }
  0x55   : > { %720 = vmatmul.bf16.gmra.mxu1 %v495_v32 }
  0x56   : > { %848 = vmatmul.bf16.gmra.mxu2 %v3252_v47 }
  0x64   : > { %612 = vmatmul.bf16.gmra.mxu0 %v496_v38 }
  0x65   : > { %725 = vmatmul.bf16.gmra.mxu1 %v496_v38 }
  0x66   : > { %853 = vmatmul.bf16.gmra.mxu2 %v3259_v53 }
  0x74   : > { %617 = vmatmul.bf16.gmra.mxu0 %v497_v44 }
  0x75   : > { %730 = vmatmul.bf16.gmra.mxu1 %v497_v44 }
  0x76   : > { %858 = vmatmul.bf16.gmra.mxu2 %v3266_v59 }
  0x84   : > { %622 = vmatmul.bf16.gmra.mxu0 %v498_v50 }
  0x85   : > { %735 = vmatmul.bf16.gmra.mxu1 %v498_v50 }
  0x94   : > { %627 = vmatmul.bf16.gmra.mxu0 %v499_v56 }
  0x95   : > { %740 = vmatmul.bf16.gmra.mxu1 %v499_v56  ;;  %v1044_v56 = vperm.slane %v3349_v51, 0 }
  0xa4   : > { %632 = vmatmul.bf16.gmra.mxu0 %v500_v62 }
  0xa5   : > { %745 = vmatmul.bf16.gmra.mxu1 %v500_v62  ;;  %v889_v62 = vrot.slane %v3349_v51, 4 }
  0xa7   : > { %v1048_v15 = vperm.slane %v889_v62, 0 }
  0xb1   : > { %v598_v2 = vpop.f32.mrf.mxu0 }
  0xb2   : > { %v3275_v3 = vpop.f32.mrf.mxu1  ;;  %v932_v27 = vmul.f32 %v900_v24, %v598_v2 }
  0xb3   : > { %v3359_v6 = vmul.f32 %v1044_v56, %v3275_v3  ;;  %v888_v56 = vrot.slane %v3349_v51, 3 }
  0xb4   : > { %v964_v31 = vmin.f32 %v932_v27, 0.0  ;;  %vm948_vm0 = vcmp.gt.f32.partialorder %v932_v27, 0.0 }
  0xb5   : > { %823 = vmatmul.bf16.vlgmr.msrb.gmra.mxu1 %v3273_v1  ;;  %v1108_v24 = vmin.f32 %v3359_v6, 0.0  ;;  %vm1092_vm4 = vcmp.gt.f32.partialorder %v3359_v6, 0.0 }
  0xb6   : > { %v980_v36 = vmul.f32 1.442695, %v964_v31 }
  0xb8   : > { %2809 = vpow2.f32 %v980_v36  ;;  %v878_v36 = vrot.slane %v3329_v34, 4 }
  0xb9   : > { %v600_v4 = vpop.f32.mrf.mxu0  ;;  %v3321_v25 = vpop.f32.mrf.mxu2 }
  0xba   : > { %v3278_v5 = vpop.f32.mrf.mxu1  ;;  %v933_v28 = vmul.f32 %v901_v26, %v600_v4  ;;  %v877_v4 = vrot.slane %v3329_v34, 3  ;;  %v869_v26 = vrot.slane %v3313_v20, 2 }
  0xbc   : > { %v965_v32 = vmin.f32 %v933_v28, 0.0  ;;  %vm949_vm1 = vcmp.gt.f32.partialorder %v933_v28, 0.0  ;;  %v911_v21 = vperm.slane %v877_v4, 0 }
  0xbe   : > { %v982_v38 = vmul.f32 1.442695, %v965_v32  ;;  %v2810_v44 = vpop.eup %2809 }
  0xbf   : > { %v2577_v50 = vadd.f32 -1.0, %v2810_v44  ;;  %v902_v44 = vperm.slane %v869_v26, 0 }
  0xc0   : > { %2811 = vpow2.f32 %v982_v38  ;;  %v887_v38 = vrot.slane %v3349_v51, 2 }
  0xc1   : > { %v3284_v9 = vpop.f32.mrf.mxu0  ;;  %v3327_v33 = vpop.f32.mrf.mxu2  ;;  %v1028_v55 = vsel %vm948_vm0, %v932_v27, %v2577_v50 }
  0xc2   : > { %v3286_v10 = vpop.f32.mrf.mxu1  ;;  %v1204_v57 = vpack.c.bf16 %v1028_v55, %v1028_v55  ;;  %v3372_v55 = vmul.f32 %v902_v44, %v3284_v9 }
  0xc4   : > { %1227 = vmatpush.bf16.xpose.msra.mxu3 %v1204_v57  ;;  %vm950_vm8 = vcmp.gt.f32.partialorder %v3372_v55, 0.0 }
  0xc5   : > { %828 = vmatmul.bf16.gmra.mxu1 %v3282_v8 }
  0xc6   : > { %v2812_v48 = vpop.eup %2811 }
  0xc7   : > { %v2578_v52 = vadd.f32 -1.0, %v2812_v48 }
  0xc9   : > { %v3289_v11 = vpop.f32.mrf.mxu0  ;;  %v3336_v43 = vpop.f32.mrf.mxu2  ;;  %v1029_v58 = vsel %vm949_vm1, %v933_v28, %v2578_v52 }
  0xca   : > { %v3291_v12 = vpop.f32.mrf.mxu1  ;;  %v1205_v61 = vpack.c.bf16 %v1029_v58, %v1029_v58  ;;  %v3376_v58 = vld [vmem:[%s3341_s13 + $0x8] sm:$0xff]  ;;  %s2352_s13 = scalar_lea.hbm %s3855_s11, %s2750_s30 }
  0xcb   : > { %s2355_s22 = sshll.u32 %s2352_s13, 4  ;;  %s2356_s22 = int_to_ptr.hbm [resolvable:$true] %s2355_s22 }
  0xcc   : > { %1240 = vmatpush.bf16.xpose.msrb.mxu3 %v1205_v61 }
  0xd1   : > { %v3294_v13 = vpop.f32.mrf.mxu0  ;;  %v3352_v60 = vpop.f32.mrf.mxu2 }
  0xd2   : > { %v3296_v14 = vpop.f32.mrf.mxu1 }
  0xd3   : > { %v3364_v27 = vmul.f32 %v1048_v15, %v3296_v14  ;;  %v912_v14 = vperm.slane %v878_v36, 0  ;;  %v879_v15 = vrot.slane %v3329_v34, 5  ;;  %v1047_v36 = vperm.slane %v888_v56, 0 }
  0xd5   : > { %833 = vmatmul.bf16.gmra.mxu1 %v3300_v17  ;;  %v1112_v48 = vmin.f32 %v3364_v27, 0.0  ;;  %vm1096_vm7 = vcmp.gt.f32.partialorder %v3364_v27, 0.0 }
  0xd7   : > { %v1132_v57 = vmul.f32 1.442695, %v1112_v48 }
  0xd9   : > { %v3305_v18 = vpop.f32.mrf.mxu0  ;;  %v849_v3 = vpop.f32.mrf.mxu2 }
  0xda   : > { %v3307_v19 = vpop.f32.mrf.mxu1 }
  0xe1   : > { %v3316_v22 = vpop.f32.mrf.mxu0  ;;  %v3386_v26 = vpop.f32.mrf.mxu2 }
  0xe2   : > { %v3318_v23 = vpop.f32.mrf.mxu1 }
  0xe9   : > { %v3323_v29 = vpop.f32.mrf.mxu0 }
  0xea   : > { %v3325_v30 = vpop.f32.mrf.mxu1 }
  0xf1   : > { %v618_v39 = vpop.f32.mrf.mxu0 }
  0xf2   : > { %v3332_v40 = vpop.f32.mrf.mxu1  ;;  %v3334_v42 = vmul.f32 %v908_v37, %v618_v39  ;;  %v1124_v37 = vmul.f32 1.442695, %v1108_v24 }
  0xf9   : > { %v3343_v45 = vpop.f32.mrf.mxu0 }
  0xfa   : > { %v3345_v46 = vpop.f32.mrf.mxu1 }
 0x101   : > { %v623_v63 = vpop.f32.mrf.mxu0 }
 0x102   : > { %v3355_v0 = vpop.f32.mrf.mxu1  ;;  %v942_v2 = vmul.f32 %v910_v54, %v623_v63  ;;  %v1046_v54 = vperm.slane %v887_v38, 0 }
 0x104   : > { %v974_v7 = vmin.f32 %v942_v2, 0.0  ;;  %vm958_vm2 = vcmp.gt.f32.partialorder %v942_v2, 0.0  ;;  %v3384_v9 = vmul.f32 %v1046_v54, %v3286_v10  ;;  %v3391_v54 = vmul.f32 %v1047_v36, %v3291_v12 }
 0x106   : > { %v1000_v16 = vmul.f32 1.442695, %v974_v7  ;;  %v1110_v10 = vmin.f32 %v3384_v9, 0.0  ;;  %v1111_v36 = vmin.f32 %v3391_v54, 0.0  ;;  %vm1094_vm9 = vcmp.gt.f32.partialorder %v3384_v9, 0.0 }
 0x107   : > { %vm1095_vm12 = vcmp.gt.f32.partialorder %v3391_v54, 0.0 }
 0x108   : > { %2813 = vpow2.f32 %v1000_v16  ;;  %v897_v16 = vrot.slane %v3376_v58, 5  ;;  %v1128_v12 = vmul.f32 1.442695, %v1110_v10 }
 0x109   : > { %v625_v28 = vpop.f32.mrf.mxu0  ;;  %2815 = vpow2.f32 %v1124_v37 }
 0x10a   : > { %v3366_v31 = vpop.f32.mrf.mxu1  ;;  %v943_v32 = vmul.f32 %v911_v21, %v625_v28  ;;  %v891_v21 = vrot.slane %v3349_v51, 6  ;;  %v1057_v44 = vperm.slane %v897_v16, 0 }
 0x10c   : > { %v975_v39 = vmin.f32 %v943_v32, 0.0  ;;  %vm959_vm3 = vcmp.gt.f32.partialorder %v943_v32, 0.0  ;;  %v1050_v48 = vperm.slane %v891_v21, 0 }
 0x10e   : > { %v2814_v49 = vpop.eup %2813  ;;  %v1002_v50 = vmul.f32 1.442695, %v975_v39  ;;  %v913_v39 = vperm.slane %v879_v15, 0  ;;  %v3400_v21 = vmul.f32 %v1050_v48, %v3318_v23  ;;  %v854_v23 = vpop.f32.mrf.mxu2 }
 0x10f   : > { %v2587_v52 = vadd.f32 -1.0, %v2814_v49  ;;  %v2816_v28 = vpop.eup %2815 }
 0x110   : > { %2817 = vpow2.f32 %v1002_v50  ;;  %v1198_v50 = vpack.c.bf16 %v849_v3, %v849_v3  ;;  %v898_v3 = vrot.slane %v3376_v58, 6  ;;  %v1114_v48 = vmin.f32 %v3400_v21, 0.0 }
 0x111   : > { %v1038_v61 = vsel %vm958_vm2, %v942_v2, %v2587_v52  ;;  %v628_v62 = vpop.f32.mrf.mxu0  ;;  %v966_v2 = vmin.f32 %v3372_v55, 0.0  ;;  %2819 = vpow2.f32 %v1132_v57  ;;  %v880_v57 = vrot.slane %v3329_v34, 6 }
 0x112   : > { %v3378_v63 = vpop.f32.mrf.mxu1  ;;  %v1214_v4 = vpack.c.bf16 %v1038_v61, %v1038_v61  ;;  %v944_v7 = vmul.f32 %v912_v14, %v628_v62  ;;  %v2593_v14 = vadd.f32 -1.0, %v2816_v28  ;;  %v892_v28 = vrot.slane %v3349_v51, 7 }
 0x113   : > { %v984_v52 = vmul.f32 1.442695, %v966_v2  ;;  %vm1098_vm11 = vcmp.gt.f32.partialorder %v3400_v21, 0.0 }
 0x114   : > { %v976_v24 = vmin.f32 %v944_v7, 0.0  ;;  %1357 = vmatpush.bf16.xpose.msra.mxu1 %v1214_v4  ;;  %v1172_v2 = vsel %vm1092_vm4, %v3359_v6, %v2593_v14  ;;  %vm960_vm5 = vcmp.gt.f32.partialorder %v944_v7, 0.0  ;;  %vm956_vm4 = vcmp.gt.f32.partialorder %v3334_v42, 0.0 }
 0x116   : > { %v2818_v37 = vpop.eup %2817  ;;  %v1004_v38 = vmul.f32 1.442695, %v976_v24 }
 0x117   : > { %v2588_v49 = vadd.f32 -1.0, %v2818_v37  ;;  %v2820_v16 = vpop.eup %2819 }
 0x118   : > { %2821 = vpow2.f32 %v1004_v38  ;;  %v914_v38 = vperm.slane %v880_v57, 0 }
 0x119   : > { %v1039_v61 = vsel %vm959_vm3, %v943_v32, %v2588_v49  ;;  %v630_v62 = vpop.f32.mrf.mxu0  ;;  %v870_v32 = vrot.slane %v3313_v20, 3  ;;  %2823 = vpow2.f32 %v984_v52  ;;  %v1051_v49 = vperm.slane %v892_v28, 0 }
 0x11a   : > { %v743_v56 = vpop.f32.mrf.mxu1  ;;  %v1215_v4 = vpack.c.bf16 %v1039_v61, %v1039_v61  ;;  %v3394_v24 = vmul.f32 %v913_v39, %v630_v62  ;;  %v1058_v39 = vperm.slane %v898_v3, 0  ;;  %v1653_v61 = vpack.c.bf16 %v1172_v2, %v1172_v2 }
 0x11b   : > { %v3396_v15 = vmul.f32 %v1057_v44, %v743_v56  ;;  %1358 = vmatmul.bf16.vlgmr.msra.gmra.mxu1 %v1198_v50  ;;  %v2597_v44 = vadd.f32 -1.0, %v2820_v16  ;;  %2825 = vpow2.f32 %v1128_v12  ;;  %v903_v10 = vperm.slane %v870_v32, 0 }
 0x11c   : > { %1370 = vmatpush.bf16.xpose.msrb.mxu1 %v1215_v4  ;;  %v1130_v62 = vmul.f32 1.442695, %v1111_v36  ;;  %v881_v52 = vrot.slane %v3329_v34, 7  ;;  %v899_v16 = vrot.slane %v3376_v58, 7  ;;  %v1136_v2 = vmul.f32 1.442695, %v1114_v48  ;;  %v3424_v48 = vpop.f32.mrf.mxu2 }
 0x11d   : > { %v1176_v28 = vsel %vm1096_vm7, %v3364_v27, %v2597_v44  ;;  %v3415_v12 = vmul.f32 %v1051_v49, %v3325_v30  ;;  %v1199_v30 = vpack.c.bf16 %v3386_v26, %v3386_v26  ;;  %v1200_v44 = vpack.c.bf16 %v854_v23, %v854_v23 }
 0x11e   : > { %v2822_v37 = vpop.eup %2821  ;;  %2827 = vpow2.f32 %v1130_v62  ;;  %v871_v23 = vrot.slane %v3313_v20, 4  ;;  %vm961_vm7 = vcmp.gt.f32.partialorder %v3394_v24, 0.0 }
 0x11f   : > { %v2589_v50 = vadd.f32 -1.0, %v2822_v37  ;;  %v2824_v32 = vpop.eup %2823  ;;  %v1674_v37 = vsel %vm1672_vm6, %v1653_v61, 0  ;;  %2829 = vpow2.f32 %v1136_v2  ;;  %v1115_v27 = vmin.f32 %v3415_v12, 0.0 }
 0x120   : > { %v2579_v62 = vadd.f32 -1.0, %v2824_v32  ;;  %vm1099_vm15 = vcmp.gt.f32.partialorder %v3415_v12, 0.0 }
 0x121   : > { %v633_v6 = vpop.f32.mrf.mxu0  ;;  %v1040_v56 = vsel %vm960_vm5, %v944_v7, %v2589_v50  ;;  %v3419_v7 = vmul.f32 %v903_v10, %v3289_v11 }
 0x122   : > { %v746_v14 = vpop.f32.mrf.mxu1  ;;  %v946_v57 = vmul.f32 %v914_v38, %v633_v6  ;;  %v1216_v3 = vpack.c.bf16 %v1040_v56, %v1040_v56  ;;  %v2826_v38 = vpop.eup %2825  ;;  %v915_v6 = vperm.slane %v881_v52, 0 }
 0x123   : > { %v3410_v4 = vmul.f32 %v1058_v39, %v746_v14  ;;  %v1657_v39 = vpack.c.bf16 %v1176_v28, %v1176_v28  ;;  %v1059_v14 = vperm.slane %v899_v16, 0  ;;  %v2595_v49 = vadd.f32 -1.0, %v2826_v38 }
 0x124   : > { %v978_v36 = vmin.f32 %v946_v57, 0.0  ;;  %1383 = vmatpush.bf16.xpose.msrb.mxu2 %v1216_v3  ;;  %v967_v11 = vmin.f32 %v3419_v7, 0.0  ;;  %v2828_v52 = vpop.eup %2827  ;;  %v1138_v16 = vmul.f32 1.442695, %v1115_v27  ;;  %v1030_v38 = vsel %vm950_vm8, %v3372_v55, %v2579_v62 }
 0x125   : > { %v1750_v26 = vsel %vm1672_vm6, %v1657_v39, 0  ;;  %v2830_v2 = vpop.eup %2829  ;;  %v1174_v32 = vsel %vm1094_vm9, %v3384_v9, %v2595_v49  ;;  %vm962_vm10 = vcmp.gt.f32.partialorder %v946_v57, 0.0  ;;  %v904_v39 = vperm.slane %v871_v23, 0  ;;  %v859_v9 = vpop.f32.mrf.mxu2 }
 0x126   : > { %v1008_v50 = vmul.f32 1.442695, %v978_v36  ;;  %v986_v36 = vmul.f32 1.442695, %v967_v11  ;;  %v2599_v27 = vadd.f32 -1.0, %v2830_v2  ;;  %v1202_v2 = vpack.c.bf16 %v859_v9, %v859_v9 }
 0x127   : > { %v936_v62 = vmul.f32 %v904_v39, %v3294_v13  ;;  %vm951_vm14 = vcmp.gt.f32.partialorder %v3419_v7, 0.0  ;;  %v872_v39 = vrot.slane %v3313_v20, 5  ;;  %vm1460_vm8 = vcmask 64512  }
 0x128   : > { %2831 = vpow2.f32 %v1008_v50  ;;  %v1178_v55 = vsel %vm1098_vm11, %v3400_v21, %v2599_v27 }
 0x129   : > { %v635_v61 = vpop.f32.mrf.mxu0  ;;  %2833 = vpow2.f32 %v1138_v16  ;;  %v1659_v23 = vpack.c.bf16 %v1178_v55, %v1178_v55  ;;  %v968_v21 = vmin.f32 %v936_v62, 0.0  ;;  %vm952_vm0 = vcmp.gt.f32.partialorder %v936_v62, 0.0 }
 0x12a   : > { %v748_v10 = vpop.f32.mrf.mxu1  ;;  %v947_v56 = vmul.f32 %v915_v6, %v635_v61 }
 0x12b   : > { %v3427_v3 = vmul.f32 %v1059_v14, %v748_v10  ;;  %1384 = vmatmul.bf16.vlgmr.msrb.gmra.mxu2 %v1200_v44  ;;  %1371 = vmatmul.bf16.vlgmr.msrb.gmra.mxu1 %v1199_v30  ;;  %v1655_v14 = vpack.c.bf16 %v1174_v32, %v1174_v32  ;;  %v1206_v30 = vpack.c.bf16 %v1030_v38, %v1030_v38  ;;  %v2596_v44 = vadd.f32 -1.0, %v2828_v52 }
 0x12c   : > { %1683 = vmatpush.bf16.msra.mxu2 %v1674_v37  ;;  %v979_v28 = vmin.f32 %v947_v56, 0.0  ;;  %vm963_vm13 = vcmp.gt.f32.partialorder %v947_v56, 0.0  ;;  %v1788_v13 = vsel %vm1672_vm6, %v1659_v23, 0 }
 0x12d   : > { %v1712_v49 = vsel %vm1672_vm6, %v1655_v14, 0  ;;  %v1175_v52 = vsel %vm1095_vm12, %v3391_v54, %v2596_v44  ;;  %v988_v14 = vmul.f32 1.442695, %v968_v21 }
 0x12e   : > { %v2832_v37 = vpop.eup %2831  ;;  %v1010_v50 = vmul.f32 1.442695, %v979_v28 }
 0x12f   : > { %v2591_v6 = vadd.f32 -1.0, %v2832_v37  ;;  %v2834_v11 = vpop.eup %2833 }
 0x130   : > { %1759 = vmatpush.bf16.msrb.mxu2 %v1750_v26  ;;  %2835 = vpow2.f32 %v1010_v50  ;;  %v2600_v32 = vadd.f32 -1.0, %v2834_v11  ;;  %v861_v50 = vpop.f32.mrf.mxu2 }
 0x131   : > { %2837 = vpow2.f32 %v986_v36  ;;  %v1042_v10 = vsel %vm962_vm10, %v946_v57, %v2591_v6  ;;  %v1656_v36 = vpack.c.bf16 %v1175_v52, %v1175_v52  ;;  %v873_v52 = vrot.slane %v3313_v20, 6 }
 0x132   : > { %v824_v61 = vpop.f32.mrf.mxu1  ;;  %v1218_v35 = vpack.c.bf16 %v1042_v10, %v1042_v10  ;;  %v1179_v6 = vsel %vm1099_vm15, %v3415_v12, %v2600_v32  ;;  %2839 = vpow2.f32 %v988_v14  ;;  %v905_v10 = vperm.slane %v872_v39, 0 }
 0x133   : > { %v1188_v26 = vpack.c.bf16 %v824_v61, %v824_v61  ;;  %v1731_v54 = vsel %vm1672_vm6, %v1656_v36, 0  ;;  %v1660_v44 = vpack.c.bf16 %v1179_v6, %v1179_v6 }
 0x134   : > { %1409 = vmatpush.bf16.xpose.msrb.mxu0 %v1218_v35  ;;  %v937_v12 = vmul.f32 %v905_v10, %v3305_v18  ;;  %v972_v10 = vmin.f32 %v3334_v42, 0.0 }
 0x135   : > { %1228 = vmatmul.bf16.vlgmr.msra.gmra.mxu3 %v1188_v26  ;;  %v1807_v9 = vsel %vm1672_vm6, %v1660_v44, 0 }
 0x136   : > { %1253 = vmatpush.bf16.xpose.msra.mxu3 %v1206_v30  ;;  %v2836_v57 = vpop.eup %2835  ;;  %v1203_v30 = vpack.c.bf16 %v861_v50, %v861_v50  ;;  %vm953_vm1 = vcmp.gt.f32.partialorder %v937_v12, 0.0 }
 0x137   : > { %v2838_v16 = vpop.eup %2837  ;;  %v2592_v28 = vadd.f32 -1.0, %v2836_v57 }
 0x138   : > { %v2580_v35 = vadd.f32 -1.0, %v2838_v16  ;;  %v2840_v55 = vpop.eup %2839 }
 0x139   : > { %v1043_v37 = vsel %vm963_vm13, %v947_v56, %v2592_v28  ;;  %v2581_v11 = vadd.f32 -1.0, %v2840_v55 }
 0x13a   : > { %v1219_v38 = vpack.c.bf16 %v1043_v37, %v1043_v37  ;;  %v1031_v56 = vsel %vm951_vm14, %v3419_v7, %v2580_v35  ;;  %v826_v27 = vpop.f32.mrf.mxu1  ;;  %v874_v35 = vrot.slane %v3313_v20, 7 }
 0x13b   : > { %1410 = vmatmul.bf16.vlgmr.msrb.gmra.mxu0 %v1202_v2  ;;  %v1207_v61 = vpack.c.bf16 %v1031_v56, %v1031_v56  ;;  %v1189_v26 = vpack.c.bf16 %v826_v27, %v826_v27  ;;  %v1032_v16 = vsel %vm952_vm0, %v936_v62, %v2581_v11  ;;  %v906_v2 = vperm.slane %v873_v52, 0 }
 0x13c   : > { %1721 = vmatpush.bf16.msra.mxu0 %v1712_v49  ;;  %1422 = vmatpush.bf16.xpose.msra.mxu1 %v1219_v38  ;;  %v969_v49 = vmin.f32 %v937_v12, 0.0  ;;  %v1208_v28 = vpack.c.bf16 %v1032_v16, %v1032_v16  ;;  %v907_v62 = vperm.slane %v874_v35, 0  ;;  %vm1105_vm0 = vcmp.gt.f32.partialorder %v3396_v15, 0.0 }
 0x13d   : > { %v938_v32 = vmul.f32 %v906_v2, %v3316_v22 }
 0x13e   : > { %v990_v7 = vmul.f32 1.442695, %v969_v49  ;;  %v939_v6 = vmul.f32 %v907_v62, %v3323_v29  ;;  %v875_v29 = vrot.slane %v3329_v34, 1  ;;  %v1194_v34 = vpack.c.bf16 %v3321_v25, %v3321_v25 }
 0x13f   : > { %v970_v18 = vmin.f32 %v938_v32, 0.0  ;;  %vm954_vm2 = vcmp.gt.f32.partialorder %v938_v32, 0.0 }
 0x140   : > { %1797 = vmatpush.bf16.msrb.mxu0 %v1788_v13  ;;  %2841 = vpow2.f32 %v990_v7  ;;  %v971_v22 = vmin.f32 %v939_v6, 0.0  ;;  %vm955_vm3 = vcmp.gt.f32.partialorder %v939_v6, 0.0  ;;  %v909_v7 = vperm.slane %v875_v29, 0 }
 0x141   : > { %v992_v37 = vmul.f32 1.442695, %v970_v18  ;;  %v977_v18 = vmin.f32 %v3394_v24, 0.0 }
 0x142   : > { %v829_v57 = vpop.f32.mrf.mxu1  ;;  %v994_v56 = vmul.f32 1.442695, %v971_v22  ;;  %v941_v52 = vmul.f32 %v909_v7, %v3343_v45 }
 0x143   : > { %1423 = vmatmul.bf16.vlgmr.msra.gmra.mxu1 %v1203_v30  ;;  %v1190_v23 = vpack.c.bf16 %v829_v57, %v829_v57  ;;  %2843 = vpow2.f32 %v992_v37  ;;  %v1006_v37 = vmul.f32 1.442695, %v977_v18 }
 0x144   : > { %1740 = vmatpush.bf16.msrb.mxu1 %v1731_v54  ;;  %2845 = vpow2.f32 %v994_v56  ;;  %v973_v16 = vmin.f32 %v941_v52, 0.0  ;;  %vm957_vm5 = vcmp.gt.f32.partialorder %v941_v52, 0.0 }
 0x145   : > { %1241 = vmatmul.bf16.vlgmr.msrb.gmra.mxu3 %v1189_v26 }
 0x146   : > { %1266 = vmatpush.bf16.xpose.msrb.mxu3 %v1207_v61  ;;  %v2842_v36 = vpop.eup %2841 }
 0x147   : > { %v2582_v21 = vadd.f32 -1.0, %v2842_v36 }
 0x148   : > { %1816 = vmatpush.bf16.msra.mxu1 %v1807_v9  ;;  %v996_v9 = vmul.f32 1.442695, %v972_v10 }
 0x149   : > { %v1033_v13 = vsel %vm953_vm1, %v937_v12, %v2582_v21  ;;  %v2844_v14 = vpop.eup %2843  ;;  %v886_v21 = vrot.slane %v3349_v51, 1  ;;  %vm1106_vm1 = vcmp.gt.f32.partialorder %v3410_v4, 0.0 }
 0x14a   : > { %v831_v38 = vpop.f32.mrf.mxu1  ;;  %v1209_v50 = vpack.c.bf16 %v1033_v13, %v1033_v13  ;;  %v2583_v39 = vadd.f32 -1.0, %v2844_v14  ;;  %v2846_v20 = vpop.eup %2845  ;;  %2847 = vpow2.f32 %v996_v9  ;;  %v890_v14 = vrot.slane %v3349_v51, 5 }
 0x14b   : > { %v1191_v54 = vpack.c.bf16 %v831_v38, %v831_v38  ;;  %v2584_v26 = vadd.f32 -1.0, %v2846_v20  ;;  %v1045_v38 = vperm.slane %v886_v21, 0 }
 0x14c   : > { %v1034_v30 = vsel %vm954_vm2, %v938_v32, %v2583_v39  ;;  %v1049_v39 = vperm.slane %v890_v14, 0  ;;  %vm1107_vm2 = vcmp.gt.f32.partialorder %v3427_v3, 0.0 }
 0x14d   : > { %v1210_v61 = vpack.c.bf16 %v1034_v30, %v1034_v30  ;;  %v1035_v55 = vsel %vm955_vm3, %v939_v6, %v2584_v26  ;;  %v1077_v25 = vmul.f32 %v1045_v38, %v3278_v5  ;;  %v1432_v38 = vld [vmem:[%s3475_s16 + $0x20] sm:$0xff] }
 0x14e   : > { %v1211_v11 = vpack.c.bf16 %v1035_v55, %v1035_v55  ;;  %v1081_v5 = vmul.f32 %v1049_v39, %v3307_v19  ;;  %v1197_v19 = vpack.c.bf16 %v3352_v60, %v3352_v60  ;;  %v1201_v60 = vpack.c.bf16 %v3424_v48, %v3424_v48  ;;  %v1434_v39 = vld [vmem:[%s3475_s16 + $0x30] sm:$0xff] }
 0x14f   : > { %vm1093_vm9 = vcmp.gt.f32.partialorder %v1077_v25, 0.0 }
 0x150   : > { %v2848_v57 = vpop.eup %2847  ;;  %vm1097_vm10 = vcmp.gt.f32.partialorder %v1081_v5, 0.0 }
 0x152   : > { %v834_v27 = vpop.f32.mrf.mxu1 }
 0x153   : > { %v1192_v44 = vpack.c.bf16 %v834_v27, %v834_v27  ;;  %v1428_v27 = vld [vmem:[%s3475_s16] sm:$0xff] }
 0x155   : > { %1254 = vmatmul.bf16.vlgmr.msra.gmra.mxu3 %v1190_v23  ;;  %v2585_v23 = vadd.f32 -1.0, %v2848_v57 }
 0x156   : > { %1279 = vmatpush.bf16.xpose.msra.mxu3 %v1208_v28  ;;  %v998_v28 = vmul.f32 1.442695, %v973_v16 }
 0x157   : > { %v1036_v2 = vsel %vm956_vm4, %v3334_v42, %v2585_v23  ;;  %v1195_v42 = vpack.c.bf16 %v3327_v33, %v3327_v33  ;;  %v1196_v33 = vpack.c.bf16 %v3336_v43, %v3336_v43 }
 0x158   : > { %v1212_v32 = vpack.c.bf16 %v1036_v2, %v1036_v2  ;;  %2849 = vpow2.f32 %v998_v28  ;;  %v1430_v2 = vld [vmem:[%s3475_s16 + $0x10] sm:$0xff] }
 0x159   : > { %2851 = vpow2.f32 %v1006_v37 }
 0x15a   : > { %v836_v12 = vpop.f32.mrf.mxu1 }
 0x15b   : > { %v1193_v49 = vpack.c.bf16 %v836_v12, %v836_v12  ;;  %v1429_v12 = vld [vmem:[%s3475_s16 + $0x8] sm:$0xff] }
 0x15e   : > { %v2850_v36 = vpop.eup %2849 }
 0x15f   : > { %v2586_v45 = vadd.f32 -1.0, %v2850_v36 }
 0x161   : > { %v1037_v35 = vsel %vm957_vm5, %v941_v52, %v2586_v45  ;;  %v1431_v45 = vld [vmem:[%s3475_s16 + $0x18] sm:$0xff] }
 0x162   : > { %v1213_v13 = vpack.c.bf16 %v1037_v35, %v1037_v35 }
 0x165   : > { %1267 = vmatmul.bf16.vlgmr.msrb.gmra.mxu3 %v1191_v54  ;;  %v2852_v54 = vpop.eup %2851 }
 0x166   : > { %1292 = vmatpush.bf16.xpose.msrb.mxu3 %v1209_v50  ;;  %v1109_v50 = vmin.f32 %v1077_v25, 0.0  ;;  %v2590_v62 = vadd.f32 -1.0, %v2852_v54 }
 0x168   : > { %v1126_v6 = vmul.f32 1.442695, %v1109_v50  ;;  %v1041_v22 = vsel %vm961_vm7, %v3394_v24, %v2590_v62  ;;  %v1113_v24 = vmin.f32 %v1081_v5, 0.0  ;;  %v1433_v50 = vld [vmem:[%s3475_s16 + $0x28] sm:$0xff] }
 0x169   : > { %v1217_v56 = vpack.c.bf16 %v1041_v22, %v1041_v22 }
 0x16a   : > { %2853 = vpow2.f32 %v1126_v6  ;;  %v1134_v20 = vmul.f32 1.442695, %v1113_v24 }
 0x16c   : > { %2855 = vpow2.f32 %v1134_v20 }
 0x170   : > { %v2854_v51 = vpop.eup %2853 }
 0x171   : > { %v2594_v43 = vadd.f32 -1.0, %v2854_v51 }
 0x172   : > { %v2856_v55 = vpop.eup %2855 }
 0x173   : > { %v1173_v10 = vsel %vm1093_vm9, %v1077_v25, %v2594_v43  ;;  %v2598_v7 = vadd.f32 -1.0, %v2856_v55 }
 0x174   : > { %v1654_v9 = vpack.c.bf16 %v1173_v10, %v1173_v10 }
 0x175   : > { %1280 = vmatmul.bf16.vlgmr.msra.gmra.mxu3 %v1192_v44  ;;  %v1177_v57 = vsel %vm1097_vm10, %v1081_v5, %v2598_v7  ;;  %v1437_v7 = vld [vmem:[%s3475_s16 + $0x48] sm:$0xff] }
 0x176   : > { %1305 = vmatpush.bf16.xpose.msra.mxu3 %v1210_v61  ;;  %v1693_v29 = vsel %vm1672_vm6, %v1654_v9, 0  ;;  %v1658_v23 = vpack.c.bf16 %v1177_v57, %v1177_v57 }
 0x178   : > { %v1769_v28 = vsel %vm1672_vm6, %v1658_v23, 0 }
 0x185   : > { %1293 = vmatmul.bf16.vlgmr.msrb.gmra.mxu3 %v1193_v49 }
 0x186   : > { %1318 = vmatpush.bf16.xpose.msrb.mxu3 %v1211_v11 }
 0x195   : > { %1306 = vmatmul.bf16.vlgmr.msra.gmra.mxu3 %v1194_v34 }
 0x196   : > { %1331 = vmatpush.bf16.xpose.msra.mxu3 %v1212_v32 }
 0x1a5   : > { %1319 = vmatmul.bf16.vlgmr.msrb.gmra.mxu3 %v1195_v42 }
 0x1a6   : > { %1344 = vmatpush.bf16.xpose.msrb.mxu3 %v1213_v13 }
 0x1b5   : > { %1332 = vmatmul.bf16.vlgmr.msra.gmra.mxu3 %v1196_v33 }
 0x1b6   : > { %1396 = vmatpush.bf16.xpose.msra.mxu3 %v1217_v56 }
 0x1b8   : > { %v1229_v30 = vpop.f32.mrf.mxu3 }
 0x1b9   : > { %v3479_v44 = vmul.f32 %v1428_v27, %v1229_v30 }
 0x1bb   : > { %v1461_v61 = vsel %vm1460_vm8, %v3479_v44, -inf }
 0x1bc   : > { %1462 = vmax.xlane.f32.xlu0 %v1461_v61 }
 0x1c0   : > { %v1231_v26 = vpop.f32.mrf.mxu3 }
 0x1c5   : > { %1345 = vmatmul.bf16.vlgmr.msrb.gmra.mxu3 %v1197_v19  ;;  %v1435_v19 = vld [vmem:[%s3475_s16 + $0x38] sm:$0xff] }
 0x1c6   : > { %1702 = vmatpush.bf16.msrb.mxu3 %v1693_v29 }
 0x1c8   : > { %v1242_v49 = vpop.f32.mrf.mxu3 }
 0x1c9   : > { %v1445_v11 = vmul.f32 %v1429_v12, %v1242_v49 }
 0x1cb   : > { %v1464_v52 = vsel %vm1460_vm8, %v1445_v11, -inf }
 0x1cc   : > { %1465 = vmax.xlane.f32.xlu0 %v1464_v52 }
 0x1d0   : > { %v1244_v16 = vpop.f32.mrf.mxu3 }
 0x1d5   : > { %1397 = vmatmul.bf16.vlgmr.msra.gmra.mxu3 %v1201_v60  ;;  %v1436_v60 = vld [vmem:[%s3475_s16 + $0x40] sm:$0xff] }
 0x1d6   : > { %1778 = vmatpush.bf16.msra.mxu3 %v1769_v28 }
 0x1d8   : > { %v1255_v34 = vpop.f32.mrf.mxu3 }
 0x1d9   : > { %v1446_v32 = vmul.f32 %v1430_v2, %v1255_v34 }
 0x1db   : > { %v1467_v36 = vsel %vm1460_vm8, %v1446_v32, -inf }
 0x1dc   : > { %1468 = vmax.xlane.f32.xlu1 %v1467_v36 }
 0x1e0   : > { %v1257_v18 = vpop.f32.mrf.mxu3 }
 0x1e8   : > { %v1268_v21 = vpop.f32.mrf.mxu3 }
 0x1e9   : > { %v3494_v37 = vmul.f32 %v1431_v45, %v1268_v21  ;;  %v1359_v21 = vpop.f32.mrf.mxu1 }
 0x1eb   : > { %v1470_v48 = vsel %vm1460_vm8, %v3494_v37, -inf }
 0x1ec   : > { %1471 = vmax.xlane.f32.xlu1 %v1470_v48 }
 0x1f0   : > { %v1270_v35 = vpop.f32.mrf.mxu3 }
 0x1f8   : > { %v1281_v42 = vpop.f32.mrf.mxu3 }
 0x1f9   : > { %v3499_v13 = vmul.f32 %v1432_v38, %v1281_v42  ;;  %v1361_v42 = vpop.f32.mrf.mxu1 }
 0x1fb   : > { %v1473_v25 = vsel %vm1460_vm8, %v3499_v13, -inf }
 0x1fc   : > { %1474 = vmax.xlane.f32.xlu2 %v1473_v25 }
 0x200   : > { %v1283_v54 = vpop.f32.mrf.mxu3 }
 0x208   : > { %v1294_v62 = vpop.f32.mrf.mxu3 }
 0x209   : > { %v3504_v6 = vmul.f32 %v1433_v50, %v1294_v62  ;;  %v1372_v62 = vpop.f32.mrf.mxu1 }
 0x20b   : > { %v1476_v14 = vsel %vm1460_vm8, %v3504_v6, -inf }
 0x20c   : > { %1477 = vmax.xlane.f32.xlu2 %v1476_v14 }
 0x210   : > { %v1296_v22 = vpop.f32.mrf.mxu3 }
 0x211   : > { %v1438_v22 = vld [vmem:[%s3475_s16 + $0x50] sm:$0xff] }
 0x218   : > { %v1307_v33 = vpop.f32.mrf.mxu3 }
 0x219   : > { %v3509_v56 = vmul.f32 %v1434_v39, %v1307_v33  ;;  %v1374_v33 = vpop.f32.mrf.mxu1 }
 0x21b   : > { %v1479_v5 = vsel %vm1460_vm8, %v3509_v56, -inf }
 0x21c   : > { %1480 = vmax.xlane.f32.xlu2 %v1479_v5  ;;  %v3547_v5 = vmul.f32 %v1438_v22, %v1359_v21 }
 0x220   : > { %v1309_v27 = vpop.f32.mrf.mxu3 }
 0x228   : > { %v1320_v51 = vpop.f32.mrf.mxu3 }
 0x229   : > { %v3519_v9 = vmul.f32 %v1435_v19, %v1320_v51  ;;  %v1439_v19 = vld [vmem:[%s3475_s16 + $0x58] sm:$0xff] }
 0x22f   : > { %v1463_v30 = vpop.xlane.xlu0 %1462 }
 0x230   : > { %v1509_v24 = vsub.f32 %v3479_v44, %v1463_v30  ;;  %v1322_v43 = vpop.f32.mrf.mxu3  ;;  %v1482_v44 = vsel %vm1460_vm8, %v3519_v9, -inf }
 0x231   : > { %v1385_v43 = vpop.f32.mrf.mxu2 }
 0x232   : > { %v1525_v61 = vmul.f32 1.442695, %v1509_v24  ;;  %v1441_v24 = vld [vmem:[%s3475_s16 + $0x68] sm:$0xff] }
 0x234   : > { %2857 = vpow2.f32 %v1525_v61 }
 0x238   : > { %v1333_v20 = vpop.f32.mrf.mxu3 }
 0x239   : > { %v3533_v28 = vmul.f32 %v1436_v60, %v1333_v20  ;;  %v1440_v60 = vld [vmem:[%s3475_s16 + $0x60] sm:$0xff] }
 0x23a   : > { %v3514_v10 = vpop.eup %2857 }
 0x23b   : > { %v1557_v26 = vsel %vm1460_vm8, %v3514_v10, 0.0  ;;  %v1485_v18 = vsel %vm1460_vm8, %v3533_v28, -inf }
 0x23c   : > { %1558 = vadd.xlane.f32.xlu0 %v1557_v26 }
 0x23f   : > { %v1466_v29 = vpop.xlane.xlu0 %1465 }
 0x240   : > { %v1510_v12 = vsub.f32 %v1445_v11, %v1466_v29  ;;  %v1335_v55 = vpop.f32.mrf.mxu3  ;;  %v1387_v29 = vpop.f32.mrf.mxu2 }
 0x242   : > { %v1527_v49 = vmul.f32 1.442695, %v1510_v12  ;;  %v3562_v12 = vmul.f32 %v1439_v19, %v1372_v62 }
 0x244   : > { %2859 = vpow2.f32 %v1527_v49  ;;  %1483 = vmax.xlane.f32.xlu0 %v1482_v44  ;;  %v1494_v44 = vsel %vm1460_vm8, %v3562_v12, -inf }
 0x248   : > { %v1346_v52 = vpop.f32.mrf.mxu3 }
 0x249   : > { %v3524_v57 = vmul.f32 %v1437_v7, %v1346_v52 }
 0x24a   : > { %v3526_v16 = vpop.eup %2859 }
 0x24b   : > { %v1560_v23 = vsel %vm1460_vm8, %v3526_v16, 0.0  ;;  %v1488_v11 = vsel %vm1460_vm8, %v3524_v57, -inf }
 0x24c   : > { %1561 = vadd.xlane.f32.xlu1 %v1560_v23  ;;  %1489 = vmax.xlane.f32.xlu2 %v1488_v11  ;;  %v3572_v11 = vmul.f32 %v1440_v60, %v1385_v43 }
 0x24f   : > { %v1469_v2 = vpop.xlane.xlu1 %1468 }
 0x250   : > { %v1511_v34 = vsub.f32 %v1446_v32, %v1469_v2  ;;  %v1348_v36 = vpop.f32.mrf.mxu3 }
 0x252   : > { %v1529_v45 = vmul.f32 1.442695, %v1511_v34 }
 0x254   : > { %2861 = vpow2.f32 %v1529_v45  ;;  %1486 = vmax.xlane.f32.xlu1 %v1485_v18  ;;  %v1052_v18 = vperm.slane %v3376_v58, 0 }
 0x256   : > { %v1084_v21 = vmul.f32 %v1052_v18, %v3332_v40 }
 0x258   : > { %v1398_v48 = vpop.f32.mrf.mxu3  ;;  %vm1100_vm11 = vcmp.gt.f32.partialorder %v1084_v21, 0.0 }
 0x259   : > { %v3553_v61 = vmul.f32 %v1441_v24, %v1398_v48 }
 0x25a   : > { %v3537_v35 = vpop.eup %2861 }
 0x25b   : > { %v1563_v38 = vsel %vm1460_vm8, %v3537_v35, 0.0  ;;  %v1500_v20 = vsel %vm1460_vm8, %v3553_v61, -inf }
 0x25c   : > { %1564 = vadd.xlane.f32.xlu0 %v1563_v38  ;;  %v1116_v38 = vmin.f32 %v1084_v21, 0.0 }
 0x25e   : > { %v1140_v42 = vmul.f32 1.442695, %v1116_v38 }
 0x25f   : > { %v1472_v25 = vpop.xlane.xlu1 %1471 }
 0x260   : > { %v1512_v32 = vsub.f32 %v3494_v37, %v1472_v25  ;;  %v1400_v54 = vpop.f32.mrf.mxu3  ;;  %v1491_v37 = vsel %vm1460_vm8, %v3547_v5, -inf }
 0x261   : > { %v1411_v54 = vpop.f32.mrf.mxu0 }
 0x262   : > { %v1531_v50 = vmul.f32 1.442695, %v1512_v32 }
 0x264   : > { %2863 = vpow2.f32 %v1531_v50  ;;  %v3585_v50 = vpop.f32.mrf.mxu1 }
 0x26a   : > { %v3542_v14 = vpop.eup %2863 }
 0x26b   : > { %v1566_v39 = vsel %vm1460_vm8, %v3542_v14, 0.0 }
 0x26c   : > { %1567 = vadd.xlane.f32.xlu1 %v1566_v39 }
 0x26f   : > { %v1475_v27 = vpop.xlane.xlu2 %1474 }
 0x270   : > { %v1513_v51 = vsub.f32 %v3499_v13, %v1475_v27  ;;  %v894_v27 = vrot.slane %v3376_v58, 2 }
 0x272   : > { %v1533_v30 = vmul.f32 1.442695, %v1513_v51 }
 0x274   : > { %2865 = vpow2.f32 %v1533_v30  ;;  %1492 = vmax.xlane.f32.xlu1 %v1491_v37  ;;  %v1413_v37 = vpop.f32.mrf.mxu0  ;;  %v1426_v30 = vpop.f32.mrf.mxu1 }
 0x27a   : > { %v3557_v26 = vpop.eup %2865 }
 0x27b   : > { %v1569_v13 = vsel %vm1460_vm8, %v3557_v26, 0.0 }
 0x27c   : > { %1570 = vadd.xlane.f32.xlu2 %v1569_v13  ;;  %1501 = vmax.xlane.f32.xlu1 %v1500_v20  ;;  %v1054_v20 = vperm.slane %v894_v27, 0 }
 0x27f   : > { %v1478_v55 = vpop.xlane.xlu2 %1477 }
 0x280   : > { %v1514_v49 = vsub.f32 %v3504_v6, %v1478_v55  ;;  %v1497_v6 = vsel %vm1460_vm8, %v3572_v11, -inf }
 0x282   : > { %v1535_v7 = vmul.f32 1.442695, %v1514_v49  ;;  %v1086_v49 = vmul.f32 %v1054_v20, %v3355_v0 }
 0x284   : > { %2867 = vpow2.f32 %v1535_v7  ;;  %1495 = vmax.xlane.f32.xlu2 %v1494_v44  ;;  %v1118_v60 = vmin.f32 %v1086_v49, 0.0  ;;  %vm1102_vm13 = vcmp.gt.f32.partialorder %v1086_v49, 0.0 }
 0x286   : > { %v1144_v0 = vmul.f32 1.442695, %v1118_v60 }
 0x28a   : > { %v3567_v52 = vpop.eup %2867 }
 0x28b   : > { %v1572_v23 = vsel %vm1460_vm8, %v3567_v52, 0.0 }
 0x28c   : > { %1573 = vadd.xlane.f32.xlu0 %v1572_v23 }
 0x28f   : > { %v1481_v2 = vpop.xlane.xlu2 %1480 }
 0x290   : > { %v1515_v34 = vsub.f32 %v3509_v56, %v1481_v2  ;;  %v893_v56 = vrot.slane %v3376_v58, 1 }
 0x292   : > { %v1537_v36 = vmul.f32 1.442695, %v1515_v34  ;;  %v1053_v25 = vperm.slane %v893_v56, 0 }
 0x294   : > { %2869 = vpow2.f32 %v1537_v36  ;;  %1498 = vmax.xlane.f32.xlu0 %v1497_v6  ;;  %v1085_v32 = vmul.f32 %v1053_v25, %v3345_v46  ;;  %v895_v36 = vrot.slane %v3376_v58, 3 }
 0x295   : > { %2871 = vpow2.f32 %v1140_v42 }
 0x296   : > { %v1117_v22 = vmin.f32 %v1085_v32, 0.0  ;;  %vm1101_vm12 = vcmp.gt.f32.partialorder %v1085_v32, 0.0  ;;  %v1055_v56 = vperm.slane %v895_v36, 0 }
 0x298   : > { %v1142_v40 = vmul.f32 1.442695, %v1117_v22 }
 0x29a   : > { %v3578_v45 = vpop.eup %2869 }
 0x29b   : > { %v1575_v48 = vsel %vm1460_vm8, %v3578_v45, 0.0  ;;  %v2872_v62 = vpop.eup %2871 }
 0x29c   : > { %1576 = vadd.xlane.f32.xlu2 %v1575_v48  ;;  %v2601_v33 = vadd.f32 -1.0, %v2872_v62 }
 0x29e   : > { %v1180_v51 = vsel %vm1100_vm11, %v1084_v21, %v2601_v33  ;;  %v1442_v21 = vld [vmem:[%s3475_s16 + $0x70] sm:$0xff] }
 0x29f   : > { %v1661_v43 = vpack.c.bf16 %v1180_v51, %v1180_v51  ;;  %v3600_v42 = vmul.f32 %v1442_v21, %v1411_v54 }
 0x2a1   : > { %v1826_v44 = vsel %vm1672_vm6, %v1661_v43, 0  ;;  %v1503_v27 = vsel %vm1460_vm8, %v3600_v42, -inf }
 0x2af   : > { %v1559_v39 = vpop.xlane.xlu0 %1558 }
 0x2b0   : > { %2873 = vrcp.f32 %v1559_v39 }
 0x2b1   : > { %2875 = vpow2.f32 %v1142_v40 }
 0x2b6   : > { %v2874_v24 = vpop.eup %2873 }
 0x2b7   : > { %v1621_v46 = vmul.f32 %v2874_v24, %v3514_v10  ;;  %v1484_v19 = vpop.xlane.xlu0 %1483  ;;  %v2876_v7 = vpop.eup %2875 }
 0x2b8   : > { %v1516_v13 = vsub.f32 %v3519_v9, %v1484_v19  ;;  %v2602_v34 = vadd.f32 -1.0, %v2876_v7  ;;  %v1443_v19 = vld [vmem:[%s3475_s16 + $0x78] sm:$0xff]  ;;  %s442_s16 = sand.u32 1, %s3023_s18  }
 0x2b9   : > { %v1637_v29 = vpack.c.bf16 %v1621_v46, %v1621_v46  ;;  %s2470_s25 = sshll.u32 %s442_s16, 7  ;;  %s2341_s21 = scalar_lea.sflag [#allocation3], %s442_s16 }
 0x2ba   : > { %v1539_v55 = vmul.f32 1.442695, %v1516_v13  ;;  %v1181_v48 = vsel %vm1101_vm12, %v1085_v32, %v2602_v34  ;;  %v1087_v32 = vmul.f32 %v1055_v56, %v3366_v31  ;;  %v896_v31 = vrot.slane %v3376_v58, 4  ;;  %s3777_s29 = scalar_lea.vmem [#allocation2], %s2470_s25  ;;  %s2983_s25 = sshra.s32 %s2356_s22, 4  ;;  %s2984_s25 = int_to_ptr.hbm [resolvable:$true] %s2983_s25 }
 0x2bb   : > { %2609 = vmatmul.msk.bf16.vlgmr.msra.gmra.mxu2 %vm1460_vm8, %v1637_v29  ;;  %v1662_v62 = vpack.c.bf16 %v1181_v48, %v1181_v48  ;;  %s2353_s15 = sshll.u32 %s3777_s29, 4  ;;  %s2985_s24 = scalar_lea.hbm %s2984_s25, 128  ;;  %s2354_s15 = int_to_ptr.vmem [resolvable:$true] %s2353_s15 }
 0x2bc   : > { %2877 = vpow2.f32 %v1539_v55  ;;  %1835 = vmatpush.bf16.msra.mxu2 %v1826_v44  ;;  %v1119_v51 = vmin.f32 %v1087_v32, 0.0  ;;  %v1056_v29 = vperm.slane %v896_v31, 0  ;;  %v3620_v44 = vmul.f32 %v1443_v19, %v3585_v50  ;;  %p2986_p12 = scmp.ne.s32.totalorder %s2984_s25, %s2985_s24  ;;  %p2990_p1 = scmp.lt.s32.totalorder %s2984_s25, %s3855_s11 }
 0x2bd   : > { %v1845_v54 = vsel %vm1672_vm6, %v1662_v62, 0  ;;  %vm1103_vm14 = vcmp.gt.f32.partialorder %v1087_v32, 0.0  ;;  %p2991_p2 = scmp.lt.s32.totalorder %s2989_s26, %s2985_s24 }
 0x2be   : > { %v1146_v43 = vmul.f32 1.442695, %v1119_v51  ;;  %v1088_v58 = vmul.f32 %v1056_v29, %v3378_v63  ;;  %p2987_p13 = pnand %p2986_p12, %p3133_p5 }
 0x2bf   : > { %v1562_v23 = vpop.xlane.xlu1 %1561  ;;  %v1490_v2 = vpop.xlane.xlu2 %1489  ;;  %p2992_p3 = por %p2991_p2, %p2990_p1 }
 0x2c0   : > { %2879 = vrcp.f32 %v1562_v23  ;;  %v1518_v10 = vsub.f32 %v3524_v57, %v1490_v2  ;;  %v1120_v34 = vmin.f32 %v1088_v58, 0.0  ;;  %vm1104_vm15 = vcmp.gt.f32.partialorder %v1088_v58, 0.0  ;;  %p2988_p0 = pneg %p2987_p13 }
 0x2c2   : > { %v3594_v9 = vpop.eup %2877  ;;  %v1543_v6 = vmul.f32 1.442695, %v1518_v10  ;;  %v1148_v50 = vmul.f32 1.442695, %v1120_v34  ;;  %p2993_p4 = pnand %p2992_p3, %p2988_p0 }
 0x2c3   : > { %v1578_v18 = vsel %vm1460_vm8, %v3594_v9, 0.0 }
 0x2c4   : > { %2881 = vpow2.f32 %v1543_v6  ;;  %1579 = vadd.xlane.f32.xlu0 %v1578_v18 }
 0x2c5   : > { %2883 = vpow2.f32 %v1144_v0 }
 0x2c6   : > { %v2880_v38 = vpop.eup %2879 }
 0x2c7   : > { %v1622_v57 = vmul.f32 %v2880_v38, %v3526_v16  ;;  %v1487_v25 = vpop.xlane.xlu1 %1486 }
 0x2c8   : > { %v1517_v22 = vsub.f32 %v3533_v28, %v1487_v25  ;;  %v1121_v25 = vmin.f32 %v3396_v15, 0.0 }
 0x2c9   : > { %v1638_v39 = vpack.c.bf16 %v1622_v57, %v1622_v57 }
 0x2ca   : > { %v3604_v33 = vpop.eup %2881  ;;  %v1541_v40 = vmul.f32 1.442695, %v1517_v22 }
 0x2cb   : > { %2610 = vmatmul.msk.bf16.vlgmr.msrb.gmra.mxu3 %vm1460_vm8, %v1638_v39  ;;  %v1584_v16 = vsel %vm1460_vm8, %v3604_v33, 0.0  ;;  %v2884_v28 = vpop.eup %2883 }
 0x2cc   : > { %2885 = vpow2.f32 %v1541_v40  ;;  %1854 = vmatpush.bf16.msrb.mxu3 %v1845_v54  ;;  %1585 = vadd.xlane.f32.xlu2 %v1584_v16  ;;  %v2603_v30 = vadd.f32 -1.0, %v2884_v28 }
 0x2cd   : > { %1504 = vmax.xlane.f32.xlu0 %v1503_v27  ;;  %v1150_v27 = vmul.f32 1.442695, %v1121_v25 }
 0x2ce   : > { %v1182_v46 = vsel %vm1102_vm13, %v1086_v49, %v2603_v30  ;;  %v1506_v49 = vsel %vm1460_vm8, %v3620_v44, -inf }
 0x2cf   : > { %v1565_v37 = vpop.xlane.xlu0 %1564  ;;  %v1663_v55 = vpack.c.bf16 %v1182_v46, %v1182_v46 }
 0x2d0   : > { %2887 = vrcp.f32 %v1565_v37 }
 0x2d1   : > { %2889 = vpow2.f32 %v1146_v43  ;;  %v1864_v23 = vsel %vm1672_vm6, %v1663_v55, 0 }
 0x2d2   : > { %v3613_v24 = vpop.eup %2885 }
 0x2d3   : > { %v1581_v20 = vsel %vm1460_vm8, %v3613_v24, 0.0 }
 0x2d4   : > { %1582 = vadd.xlane.f32.xlu1 %v1581_v20 }
 0x2d6   : > { %v2888_v13 = vpop.eup %2887 }
 0x2d7   : > { %v1623_v7 = vmul.f32 %v2888_v13, %v3537_v35  ;;  %v2890_v2 = vpop.eup %2889 }
 0x2d8   : > { %v2604_v6 = vadd.f32 -1.0, %v2890_v2 }
 0x2d9   : > { %v1639_v60 = vpack.c.bf16 %v1623_v7, %v1623_v7 }
 0x2da   : > { %v1183_v35 = vsel %vm1103_vm14, %v1087_v32, %v2604_v6 }
 0x2db   : > { %2611 = vmatmul.msk.bf16.vlgmr.msra.gmra.mxu0 %vm1460_vm8, %v1639_v60  ;;  %v1664_v18 = vpack.c.bf16 %v1183_v35, %v1183_v35 }
 0x2dc   : > { %1873 = vmatpush.bf16.msra.mxu0 %v1864_v23  ;;  %1507 = vmax.xlane.f32.xlu1 %v1506_v49 }
 0x2dd   : > { %v1883_v56 = vsel %vm1672_vm6, %v1664_v18, 0 }
 0x2df   : > { %v1568_v10 = vpop.xlane.xlu1 %1567 }
 0x2e0   : > { %2891 = vrcp.f32 %v1568_v10 }
 0x2e1   : > { %2893 = vpow2.f32 %v1148_v50 }
 0x2e6   : > { %v2892_v0 = vpop.eup %2891 }
 0x2e7   : > { %v1624_v63 = vmul.f32 %v2892_v0, %v3542_v14  ;;  %v1493_v36 = vpop.xlane.xlu1 %1492  ;;  %v2894_v57 = vpop.eup %2893 }
 0x2e8   : > { %v1519_v21 = vsub.f32 %v3547_v5, %v1493_v36  ;;  %v2605_v39 = vadd.f32 -1.0, %v2894_v57 }
 0x2e9   : > { %v1640_v48 = vpack.c.bf16 %v1624_v63, %v1624_v63 }
 0x2ea   : > { %v1545_v38 = vmul.f32 1.442695, %v1519_v21  ;;  %v1184_v54 = vsel %vm1104_vm15, %v1088_v58, %v2605_v39 }
 0x2eb   : > { %2612 = vmatmul.msk.bf16.vlgmr.msrb.gmra.mxu1 %vm1460_vm8, %v1640_v48  ;;  %v1665_v28 = vpack.c.bf16 %v1184_v54, %v1184_v54 }
 0x2ec   : > { %2895 = vpow2.f32 %v1545_v38  ;;  %1892 = vmatpush.bf16.msrb.mxu1 %v1883_v56  ;;  %v1123_v56 = vmin.f32 %v3427_v3, 0.0 }
 0x2ed   : > { %v1902_v20 = vsel %vm1672_vm6, %v1665_v28, 0 }
 0x2ee   : > { %v1154_v57 = vmul.f32 1.442695, %v1123_v56  ;;  %v2748_v56 = vld [vmem:[%s3853_s9 + $0x30] sm:$0xff] }
 0x2ef   : > { %v1571_v62 = vpop.xlane.xlu2 %1570  ;;  %v1502_v22 = vpop.xlane.xlu1 %1501 }
 0x2f0   : > { %2897 = vrcp.f32 %v1571_v62  ;;  %v1522_v14 = vsub.f32 %v3553_v61, %v1502_v22 }
 0x2f2   : > { %v3634_v40 = vpop.eup %2895  ;;  %v1551_v5 = vmul.f32 1.442695, %v1522_v14 }
 0x2f3   : > { %v1587_v32 = vsel %vm1460_vm8, %v3634_v40, 0.0 }
 0x2f4   : > { %2899 = vpow2.f32 %v1551_v5  ;;  %1588 = vadd.xlane.f32.xlu2 %v1587_v32 }
 0x2f5   : > { %2901 = vpow2.f32 %v1150_v27 }
 0x2f6   : > { %v2898_v16 = vpop.eup %2897 }
 0x2f7   : > { %v1625_v51 = vmul.f32 %v2898_v16, %v3557_v26  ;;  %v1496_v37 = vpop.xlane.xlu2 %1495  ;;  %v1122_v26 = vmin.f32 %v3410_v4, 0.0 }
 0x2f8   : > { %v1520_v30 = vsub.f32 %v3562_v12, %v1496_v37 }
 0x2f9   : > { %v1641_v61 = vpack.c.bf16 %v1625_v51, %v1625_v51  ;;  %v1152_v55 = vmul.f32 1.442695, %v1122_v26 }
 0x2fa   : > { %v3640_v31 = vpop.eup %2899  ;;  %v1547_v43 = vmul.f32 1.442695, %v1520_v30 }
 0x2fb   : > { %2613 = vmatmul.msk.bf16.vlgmr.msrb.gmra.mxu2 %vm1460_vm8, %v1641_v61  ;;  %v1596_v46 = vsel %vm1460_vm8, %v3640_v31, 0.0  ;;  %v2902_v19 = vpop.eup %2901 }
 0x2fc   : > { %2903 = vpow2.f32 %v1547_v43  ;;  %1911 = vmatpush.bf16.msrb.mxu2 %v1902_v20  ;;  %1597 = vadd.xlane.f32.xlu2 %v1596_v46  ;;  %v2606_v29 = vadd.f32 -1.0, %v2902_v19 }
 0x2fe   : > { %v1185_v60 = vsel %vm1105_vm0, %v3396_v15, %v2606_v29 }
 0x2ff   : > { %v1574_v13 = vpop.xlane.xlu0 %1573  ;;  %v1666_v23 = vpack.c.bf16 %v1185_v60, %v1185_v60 }
 0x300   : > { %2905 = vrcp.f32 %v1574_v13 }
 0x301   : > { %2907 = vpow2.f32 %v1152_v55  ;;  %v1921_v50 = vsel %vm1672_vm6, %v1666_v23, 0 }
 0x302   : > { %v3647_v12 = vpop.eup %2903 }
 0x303   : > { %v1590_v7 = vsel %vm1460_vm8, %v3647_v12, 0.0 }
 0x304   : > { %1591 = vadd.xlane.f32.xlu0 %v1590_v7 }
 0x306   : > { %v2906_v58 = vpop.eup %2905 }
 0x307   : > { %v1626_v49 = vmul.f32 %v2906_v58, %v3567_v52  ;;  %v1499_v2 = vpop.xlane.xlu0 %1498  ;;  %v2908_v35 = vpop.eup %2907 }
 0x308   : > { %v1521_v34 = vsub.f32 %v3572_v11, %v1499_v2  ;;  %v2607_v15 = vadd.f32 -1.0, %v2908_v35 }
 0x309   : > { %v1642_v10 = vpack.c.bf16 %v1626_v49, %v1626_v49 }
 0x30a   : > { %v1549_v6 = vmul.f32 1.442695, %v1521_v34  ;;  %v1186_v11 = vsel %vm1106_vm1, %v3410_v4, %v2607_v15 }
 0x30b   : > { %2614 = vmatmul.msk.bf16.vlgmr.msra.gmra.mxu3 %vm1460_vm8, %v1642_v10  ;;  %v1667_v18 = vpack.c.bf16 %v1186_v11, %v1186_v11 }
 0x30c   : > { %2909 = vpow2.f32 %v1549_v6  ;;  %1930 = vmatpush.bf16.msra.mxu3 %v1921_v50 }
 0x30d   : > { %v1940_v38 = vsel %vm1672_vm6, %v1667_v18, 0  ;;  %v2749_v18 = vld [vmem:[%s3853_s9 + $0x38] sm:$0xff] }
 0x30f   : > { %v1577_v0 = vpop.xlane.xlu2 %1576 }
 0x310   : > { %2911 = vrcp.f32 %v1577_v0 }
 0x311   : > { %2913 = vpow2.f32 %v1154_v57 }
 0x312   : > { %v3657_v63 = vpop.eup %2909 }
 0x313   : > { %v1593_v52 = vsel %vm1460_vm8, %v3657_v63, 0.0 }
 0x314   : > { %1594 = vadd.xlane.f32.xlu1 %v1593_v52 }
 0x316   : > { %v2912_v36 = vpop.eup %2911 }
 0x317   : > { %v1627_v21 = vmul.f32 %v2912_v36, %v3578_v45  ;;  %v2914_v25 = vpop.eup %2913 }
 0x318   : > { %v2608_v22 = vadd.f32 -1.0, %v2914_v25 }
 0x319   : > { %v1643_v48 = vpack.c.bf16 %v1627_v21, %v1627_v21 }
 0x31a   : > { %v1187_v4 = vsel %vm1107_vm2, %v3427_v3, %v2608_v22 }
 0x31b   : > { %2615 = vmatmul.msk.bf16.vlgmr.msrb.gmra.mxu0 %vm1460_vm8, %v1643_v48  ;;  %v1668_v14 = vpack.c.bf16 %v1187_v4, %v1187_v4  ;;  %v2747_v4 = vld [vmem:[%s3853_s9 + $0x28] sm:$0xff] }
 0x31c   : > { %1949 = vmatpush.bf16.msrb.mxu0 %v1940_v38 }
 0x31d   : > { %v1959_v51 = vsel %vm1672_vm6, %v1668_v14, 0 }
 0x337   : > { %v1580_v62 = vpop.xlane.xlu0 %1579 }
 0x338   : > { %2915 = vrcp.f32 %v1580_v62 }
 0x33e   : > { %v2916_v39 = vpop.eup %2915  ;;  %v1685_v45 = vpop.f32.mrf.mxu2 }
 0x33f   : > { %v1628_v5 = vmul.f32 %v2916_v39, %v3594_v9  ;;  %v1586_v27 = vpop.xlane.xlu2 %1585  ;;  %v1990_v30 = vmin.f32 %v1685_v45, 0.0  ;;  %vm1974_vm6 = vcmp.gt.f32.partialorder %v1685_v45, 0.0 }
 0x340   : > { %2917 = vrcp.f32 %v1586_v27  ;;  %v1505_v32 = vpop.xlane.xlu0 %1504  ;;  %v2746_v27 = vld [vmem:[%s3853_s9 + $0x20] sm:$0xff] }
 0x341   : > { %v1644_v54 = vpack.c.bf16 %v1628_v5, %v1628_v5  ;;  %v1523_v16 = vsub.f32 %v3600_v42, %v1505_v32  ;;  %v2006_v46 = vmul.f32 1.442695, %v1990_v30 }
 0x343   : > { %v1553_v28 = vmul.f32 1.442695, %v1523_v16  ;;  %2616 = vmatmul.msk.bf16.vlgmr.msra.gmra.mxu1 %vm1460_vm8, %v1644_v54 }
 0x344   : > { %1968 = vmatpush.bf16.msra.mxu1 %v1959_v51 }
 0x345   : > { %2919 = vpow2.f32 %v1553_v28 }
 0x346   : > { %v2918_v37 = vpop.eup %2917  ;;  %v1687_v3 = vpop.f32.mrf.mxu2 }
 0x347   : > { %v1630_v61 = vmul.f32 %v2918_v37, %v3604_v33  ;;  %v1583_v43 = vpop.xlane.xlu1 %1582  ;;  %v2745_v37 = vld [vmem:[%s3853_s9 + $0x18] sm:$0xff] }
 0x348   : > { %2921 = vrcp.f32 %v1583_v43 }
 0x349   : > { %v1646_v9 = vpack.c.bf16 %v1630_v61, %v1630_v61  ;;  %2923 = vpow2.f32 %v2006_v46  ;;  %v2744_v61 = vld [vmem:[%s3853_s9 + $0x10] sm:$0xff]  ;;  %v2743_v46 = vld [vmem:[%s3853_s9 + $0x8] sm:$0xff] }
 0x34b   : > { %v3674_v20 = vpop.eup %2919  ;;  %2618 = vmatmul.msk.bf16.vlgmr.msrb.gmra.mxu3 %vm1460_vm8, %v1646_v9 }
 0x34c   : > { %v1599_v42 = vsel %vm1460_vm8, %v3674_v20, 0.0 }
 0x34d   : > { %1600 = vadd.xlane.f32.xlu0 %v1599_v42 }
 0x34e   : > { %v2922_v19 = vpop.eup %2921  ;;  %v1704_v26 = vpop.f32.mrf.mxu3 }
 0x34f   : > { %v1629_v13 = vmul.f32 %v2922_v19, %v3613_v24  ;;  %v1991_v29 = vmin.f32 %v1704_v26, 0.0  ;;  %v1508_v55 = vpop.xlane.xlu1 %1507  ;;  %v2924_v23 = vpop.eup %2923  ;;  %vm1975_vm3 = vcmp.gt.f32.partialorder %v1704_v26, 0.0  ;;  %v2742_v19 = vld [vmem:[%s3853_s9] sm:$0xff] }
 0x350   : > { %v1524_v33 = vsub.f32 %v3620_v44, %v1508_v55  ;;  %v2625_v2 = vadd.f32 -1.0, %v2924_v23 }
 0x351   : > { %v1645_v7 = vpack.c.bf16 %v1629_v13, %v1629_v13  ;;  %v2008_v60 = vmul.f32 1.442695, %v1991_v29 }
 0x352   : > { %v1555_v58 = vmul.f32 1.442695, %v1524_v33  ;;  %v3686_v44 = vsel %vm1974_vm6, %v1685_v45, %v2625_v2 }
 0x353   : > { %2925 = vpow2.f32 %v2008_v60  ;;  %2617 = vmatmul.msk.bf16.vlgmr.msra.gmra.mxu2 %vm1460_vm8, %v1645_v7  ;;  %v2741_v7 = vld [vmem:[%s3852_s8 + $0x38] sm:$0xff] }
 0x354   : > { %2927 = vpow2.f32 %v1555_v58  ;;  %2158 = vmatpush.bf16.msra.mxu2 %v2749_v18  ;;  %2759 = vmatpush.bf16.msrb.mxu3 %v2741_v7  ;;  %v2734_v18 = vld [vmem:[%s3852_s8] sm:$0xff] }
 0x356   : > { %v1706_v49 = vpop.f32.mrf.mxu3 }
 0x357   : > { %v2739_v49 = vld [vmem:[%s3852_s8 + $0x28] sm:$0xff] }
 0x358   : > { %v1723_v34 = vpop.f32.mrf.mxu0  ;;  %2159 = vmatpush.bf16.msra.mxu2 %v2748_v56 }
 0x359   : > { %v2926_v10 = vpop.eup %2925  ;;  %v1992_v52 = vmin.f32 %v1723_v34, 0.0  ;;  %vm1976_vm4 = vcmp.gt.f32.partialorder %v1723_v34, 0.0 }
 0x35a   : > { %v3682_v6 = vpop.eup %2927  ;;  %v2626_v50 = vadd.f32 -1.0, %v2926_v10  ;;  %v2738_v10 = vld [vmem:[%s3852_s8 + $0x20] sm:$0xff] }
 0x35b   : > { %v1602_v24 = vsel %vm1460_vm8, %v3682_v6, 0.0  ;;  %v2010_v11 = vmul.f32 1.442695, %v1992_v52 }
 0x35c   : > { %v3688_v35 = vsel %vm1975_vm3, %v1704_v26, %v2626_v50  ;;  %1603 = vadd.xlane.f32.xlu1 %v1602_v24  ;;  %2160 = vmatpush.bf16.msra.mxu2 %v2747_v4  ;;  %v2737_v24 = vld [vmem:[%s3852_s8 + $0x18] sm:$0xff] }
 0x35d   : > { %v2086_v0 = vpack.c.bf16 %v3688_v35, %v3686_v44  ;;  %v2736_v35 = vld [vmem:[%s3852_s8 + $0x10] sm:$0xff] }
 0x360   : > { %v1725_v15 = vpop.f32.mrf.mxu0  ;;  %2161 = vmatpush.bf16.msra.mxu2 %v2746_v27 }
 0x361   : > { %v2735_v15 = vld [vmem:[%s3852_s8 + $0x8] sm:$0xff] }
 0x364   : > { %2162 = vmatpush.bf16.msra.mxu2 %v2745_v37 }
 0x367   : > { %v1589_v36 = vpop.xlane.xlu2 %1588 }
 0x368   : > { %2929 = vrcp.f32 %v1589_v36  ;;  %v1742_v21 = vpop.f32.mrf.mxu1  ;;  %2163 = vmatpush.bf16.msra.mxu2 %v2744_v61 }
 0x369   : > { %2931 = vpow2.f32 %v2010_v11  ;;  %v1993_v48 = vmin.f32 %v1742_v21, 0.0  ;;  %vm1977_vm5 = vcmp.gt.f32.partialorder %v1742_v21, 0.0 }
 0x36b   : > { %v2012_v38 = vmul.f32 1.442695, %v1993_v48 }
 0x36c   : > { %2164 = vmatpush.bf16.msra.mxu2 %v2743_v46 }
 0x36d   : > { %2933 = vpow2.f32 %v2012_v38 }
 0x36e   : > { %v2930_v57 = vpop.eup %2929 }
 0x36f   : > { %v2932_v25 = vpop.eup %2931  ;;  %v1631_v62 = vmul.f32 %v2930_v57, %v3634_v40  ;;  %v1598_v22 = vpop.xlane.xlu2 %1597 }
 0x370   : > { %2935 = vrcp.f32 %v1598_v22  ;;  %v1744_v39 = vpop.f32.mrf.mxu1  ;;  %v2627_v14 = vadd.f32 -1.0, %v2932_v25  ;;  %2165 = vmatpush.bf16.msra.mxu2 %v2742_v19 }
 0x371   : > { %v1647_v45 = vpack.c.bf16 %v1631_v62, %v1631_v62 }
 0x372   : > { %v2056_v54 = vsel %vm1976_vm4, %v1723_v34, %v2627_v14 }
 0x373   : > { %v2934_v5 = vpop.eup %2933  ;;  %2619 = vmatmul.msk.bf16.vlgmr.msra.gmra.mxu0 %vm1460_vm8, %v1647_v45 }
 0x374   : > { %v2628_v32 = vadd.f32 -1.0, %v2934_v5  ;;  %2255 = vmatpush.bf16.msra.mxu0 %v2741_v7 }
 0x376   : > { %v2936_v40 = vpop.eup %2935  ;;  %v2057_v16 = vsel %vm1977_vm5, %v1742_v21, %v2628_v32 }
 0x377   : > { %v1634_v28 = vmul.f32 %v2936_v40, %v3640_v31  ;;  %v1592_v51 = vpop.xlane.xlu0 %1591  ;;  %v2087_v3 = vpack.c.bf16 %v2057_v16, %v2056_v54 }
 0x378   : > { %2937 = vrcp.f32 %v1592_v51 }
 0x379   : > { %v1650_v30 = vpack.c.bf16 %v1634_v28, %v1634_v28 }
 0x37b   : > { %2622 = vmatmul.msk.bf16.vlgmr.msra.gmra.mxu3 %vm1460_vm8, %v1650_v30 }
 0x37e   : > { %v2938_v43 = vpop.eup %2937  ;;  %v1761_v9 = vpop.f32.mrf.mxu2 }
 0x37f   : > { %v1632_v31 = vmul.f32 %v2938_v43, %v3647_v12  ;;  %v1994_v34 = vmin.f32 %v1761_v9, 0.0  ;;  %vm1978_vm9 = vcmp.gt.f32.partialorder %v1761_v9, 0.0 }
 0x381   : > { %v1648_v42 = vpack.c.bf16 %v1632_v31, %v1632_v31  ;;  %v2014_v44 = vmul.f32 1.442695, %v1994_v34 }
 0x383   : > { %2620 = vmatmul.msk.bf16.vlgmr.msrb.gmra.mxu1 %vm1460_vm8, %v1648_v42 }
 0x386   : > { %v1763_v26 = vpop.f32.mrf.mxu2 }
 0x387   : > { %v1595_v13 = vpop.xlane.xlu1 %1594 }
 0x388   : > { %2939 = vrcp.f32 %v1595_v13 }
 0x38e   : > { %v2940_v29 = vpop.eup %2939  ;;  %v1780_v55 = vpop.f32.mrf.mxu3 }
 0x38f   : > { %v1633_v12 = vmul.f32 %v2940_v29, %v3657_v63  ;;  %v2740_v63 = vld [vmem:[%s3852_s8 + $0x30] sm:$0xff]  ;;  %v1995_v2 = vmin.f32 %v1780_v55, 0.0  ;;  %vm1979_vm7 = vcmp.gt.f32.partialorder %v1780_v55, 0.0 }
 0x390   : > { %2256 = vmatpush.bf16.msra.mxu0 %v2740_v63  ;;  %2760 = vmatpush.bf16.msrb.mxu3 %v2740_v63 }
 0x391   : > { %v1649_v33 = vpack.c.bf16 %v1633_v12, %v1633_v12  ;;  %v2016_v50 = vmul.f32 1.442695, %v1995_v2 }
 0x393   : > { %2621 = vmatmul.msk.bf16.vlgmr.msrb.gmra.mxu2 %vm1460_vm8, %v1649_v33  ;;  %2941 = vpow2.f32 %v2016_v50 }
 0x394   : > { %2257 = vmatpush.bf16.msra.mxu0 %v2739_v49  ;;  %2761 = vmatpush.bf16.msrb.mxu3 %v2739_v49  ;;  %2943 = vpow2.f32 %v2014_v44 }
 0x396   : > { %v1782_v60 = vpop.f32.mrf.mxu3 }
 0x398   : > { %v3727_v58 = vpop.f32.mrf.mxu0  ;;  %2258 = vmatpush.bf16.msra.mxu0 %v2738_v10  ;;  %2762 = vmatpush.bf16.msrb.mxu3 %v2738_v10 }
 0x399   : > { %v1996_v36 = vmin.f32 %v3727_v58, 0.0  ;;  %vm1980_vm11 = vcmp.gt.f32.partialorder %v3727_v58, 0.0 }
 0x39b   : > { %v2018_v38 = vmul.f32 1.442695, %v1996_v36 }
 0x39c   : > { %2259 = vmatpush.bf16.msra.mxu0 %v2737_v24  ;;  %2763 = vmatpush.bf16.msrb.mxu3 %v2737_v24  ;;  %v3861_v24 = vld [vmem:[#allocation6_spill] sm:$0xff] }
 0x3a0   : > { %v1801_v23 = vpop.f32.mrf.mxu0  ;;  %2260 = vmatpush.bf16.msra.mxu0 %v2736_v35  ;;  %2764 = vmatpush.bf16.msrb.mxu3 %v2736_v35 }
 0x3a3   : > { %2166 = vmatmul.bf16.vlgmr.msra.gmra.mxu2 %v2086_v0  ;;  %v2942_v0 = vpop.eup %2941 }
 0x3a4   : > { %v2944_v52 = vpop.eup %2943  ;;  %2261 = vmatpush.bf16.msra.mxu0 %v2735_v15  ;;  %2765 = vmatpush.bf16.msrb.mxu3 %v2735_v15  ;;  %v2630_v11 = vadd.f32 -1.0, %v2942_v0 }
 0x3a5   : > { %v2629_v21 = vadd.f32 -1.0, %v2944_v52 }
 0x3a6   : > { %v2059_v48 = vsel %vm1979_vm7, %v1780_v55, %v2630_v11 }
 0x3a7   : > { %v2058_v56 = vsel %vm1978_vm9, %v1761_v9, %v2629_v21 }
 0x3a8   : > { %2262 = vmatpush.bf16.msra.mxu0 %v2734_v18  ;;  %2766 = vmatpush.bf16.msrb.mxu3 %v2734_v18  ;;  %v2088_v22 = vpack.c.bf16 %v2059_v48, %v2058_v56 }
 0x3ab   : > { %2283 = vmatmul.bf16.vlgmr.msrb.gmra.mxu3 %v3245_v41 }
 0x3b3   : > { %2171 = vmatmul.bf16.gmra.mxu2 %v2087_v3 }
 0x3bb   : > { %2288 = vmatmul.bf16.gmra.mxu3 %v3252_v47 }
 0x3c0   : > { %v1601_v57 = vpop.xlane.xlu0 %1600  ;;  %v1818_v25 = vpop.f32.mrf.mxu1 }
 0x3c1   : > { %2945 = vrcp.f32 %v1601_v57  ;;  %v1997_v62 = vmin.f32 %v1818_v25, 0.0  ;;  %vm1981_vm10 = vcmp.gt.f32.partialorder %v1818_v25, 0.0 }
 0x3c2   : > { %2947 = vpow2.f32 %v2018_v38 }
 0x3c3   : > { %v2020_v4 = vmul.f32 1.442695, %v1997_v62  ;;  %2176 = vmatmul.bf16.gmra.mxu2 %v2088_v22 }
 0x3c5   : > { %2949 = vpow2.f32 %v2020_v4 }
 0x3c7   : > { %v2946_v39 = vpop.eup %2945 }
 0x3c8   : > { %v1635_v45 = vmul.f32 %v2946_v39, %v3674_v20  ;;  %v1820_v14 = vpop.f32.mrf.mxu1  ;;  %v2948_v5 = vpop.eup %2947 }
 0x3c9   : > { %v2631_v40 = vadd.f32 -1.0, %v2948_v5 }
 0x3ca   : > { %v1651_v27 = vpack.c.bf16 %v1635_v45, %v1635_v45 }
 0x3cb   : > { %v2950_v32 = vpop.eup %2949  ;;  %v2060_v37 = vsel %vm1980_vm11, %v3727_v58, %v2631_v40  ;;  %2293 = vmatmul.bf16.gmra.mxu3 %v3259_v53 }
 0x3cc   : > { %v2632_v54 = vadd.f32 -1.0, %v2950_v32  ;;  %2623 = vmatmul.msk.bf16.vlgmr.msrb.gmra.mxu0 %vm1460_vm8, %v1651_v27 }
 0x3ce   : > { %v2061_v41 = vsel %vm1981_vm10, %v1818_v25, %v2632_v54  ;;  %v1856_v16 = vpop.f32.mrf.mxu3 }
 0x3cf   : > { %v1999_v28 = vmin.f32 %v1856_v16, 0.0  ;;  %v1604_v51 = vpop.xlane.xlu1 %1603  ;;  %v2089_v20 = vpack.c.bf16 %v2061_v41, %v2060_v37  ;;  %vm1983_vm12 = vcmp.gt.f32.partialorder %v1856_v16, 0.0 }
 0x3d0   : > { %2951 = vrcp.f32 %v1604_v51 }
 0x3d1   : > { %v2024_v3 = vmul.f32 1.442695, %v1999_v28 }
 0x3d3   : > { %2181 = vmatmul.bf16.gmra.mxu2 %v2089_v20  ;;  %2953 = vpow2.f32 %v2024_v3 }
 0x3d6   : > { %v2952_v30 = vpop.eup %2951  ;;  %v1837_v61 = vpop.f32.mrf.mxu2 }
 0x3d7   : > { %v1858_v43 = vpop.f32.mrf.mxu3  ;;  %v1636_v9 = vmul.f32 %v2952_v30, %v3682_v6  ;;  %v1998_v31 = vmin.f32 %v1837_v61, 0.0  ;;  %vm1982_vm13 = vcmp.gt.f32.partialorder %v1837_v61, 0.0 }
 0x3d9   : > { %v1652_v46 = vpack.c.bf16 %v1636_v9, %v1636_v9  ;;  %v2022_v42 = vmul.f32 1.442695, %v1998_v31  ;;  %v2954_v19 = vpop.eup %2953 }
 0x3da   : > { %v2634_v47 = vadd.f32 -1.0, %v2954_v19 }
 0x3db   : > { %2955 = vpow2.f32 %v2022_v42  ;;  %2624 = vmatmul.msk.bf16.vlgmr.msra.gmra.mxu1 %vm1460_vm8, %v1652_v46  ;;  %2298 = vmatmul.bf16.gmra.mxu3 %v3266_v59 }
 0x3dc   : > { %2263 = vmatmul.bf16.vlgmr.msra.gmra.mxu0 %v3273_v1  ;;  %v2063_v55 = vsel %vm1983_vm12, %v1856_v16, %v2634_v47  ;;  %v3774_v16 = vld [vmem:[%s3854_s10] ss:$0 sm:$0xff] }
 0x3de   : > { %v1839_v26 = vpop.f32.mrf.mxu2 }
 0x3e1   : > { %v2956_v13 = vpop.eup %2955 }
 0x3e2   : > { %v2633_v29 = vadd.f32 -1.0, %v2956_v13 }
 0x3e4   : > { %v2062_v12 = vsel %vm1982_vm13, %v1837_v61, %v2633_v29 }
 0x3e5   : > { %v2090_v6 = vpack.c.bf16 %v2063_v55, %v2062_v12 }
 0x3e7   : > { %2186 = vmatmul.bf16.gmra.mxu2 %v2090_v6 }
 0x3ec   : > { %2268 = vmatmul.bf16.gmra.mxu0 %v3282_v8 }
 0x3f0   : > { %v1875_v33 = vpop.f32.mrf.mxu0 }
 0x3f1   : > { %v2000_v1 = vmin.f32 %v1875_v33, 0.0  ;;  %vm1984_vm8 = vcmp.gt.f32.partialorder %v1875_v33, 0.0 }
 0x3f3   : > { %v2026_v60 = vmul.f32 1.442695, %v2000_v1 }
 0x3f5   : > { %2957 = vpow2.f32 %v2026_v60 }
 0x3f8   : > { %v1877_v7 = vpop.f32.mrf.mxu0 }
 0x3fb   : > { %v2958_v2 = vpop.eup %2957 }
 0x3fc   : > { %2273 = vmatmul.bf16.gmra.mxu0 %v3300_v17  ;;  %v2635_v10 = vadd.f32 -1.0, %v2958_v2 }
 0x3fe   : > { %v1932_v58 = vpop.f32.mrf.mxu3  ;;  %v2064_v59 = vsel %vm1984_vm8, %v1875_v33, %v2635_v10 }
 0x3ff   : > { %v2003_v17 = vmin.f32 %v1932_v58, 0.0  ;;  %vm1987_vm15 = vcmp.gt.f32.partialorder %v1932_v58, 0.0 }
 0x400   : > { %v1894_v53 = vpop.f32.mrf.mxu1 }
 0x401   : > { %v2001_v23 = vmin.f32 %v1894_v53, 0.0  ;;  %vm1985_vm14 = vcmp.gt.f32.partialorder %v1894_v53, 0.0  ;;  %v2032_v0 = vmul.f32 1.442695, %v2003_v17 }
 0x403   : > { %v2028_v63 = vmul.f32 1.442695, %v2001_v23 }
 0x405   : > { %2959 = vpow2.f32 %v2028_v63 }
 0x406   : > { %v1934_v49 = vpop.f32.mrf.mxu3  ;;  %2961 = vpow2.f32 %v2032_v0 }
 0x408   : > { %v1896_v34 = vpop.f32.mrf.mxu1 }
 0x40b   : > { %v2960_v50 = vpop.eup %2959 }
 0x40c   : > { %v2636_v8 = vadd.f32 -1.0, %v2960_v50  ;;  %2278 = vmatmul.bf16.gmra.mxu0 %v3861_v24  ;;  %v2962_v36 = vpop.eup %2961 }
 0x40d   : > { %v2638_v21 = vadd.f32 -1.0, %v2962_v36 }
 0x40e   : > { %v2065_v44 = vsel %vm1985_vm14, %v1894_v53, %v2636_v8 }
 0x40f   : > { %v2091_v35 = vpack.c.bf16 %v2065_v44, %v2064_v59  ;;  %v2067_v56 = vsel %vm1987_vm15, %v1932_v58, %v2638_v21 }
 0x411   : > { %2191 = vmatmul.bf16.gmra.mxu2 %v2091_v35 }
 0x416   : > { %v1913_v15 = vpop.f32.mrf.mxu2 }
 0x417   : > { %v2002_v52 = vmin.f32 %v1913_v15, 0.0  ;;  %vm1986_vm0 = vcmp.gt.f32.partialorder %v1913_v15, 0.0 }
 0x419   : > { %v2030_v11 = vmul.f32 1.442695, %v2002_v52 }
 0x41b   : > { %2963 = vpow2.f32 %v2030_v11 }
 0x41e   : > { %v1915_v18 = vpop.f32.mrf.mxu2 }
 0x421   : > { %v2964_v48 = vpop.eup %2963 }
 0x422   : > { %v2637_v38 = vadd.f32 -1.0, %v2964_v48 }
 0x424   : > { %v2066_v57 = vsel %vm1986_vm0, %v1913_v15, %v2637_v38 }
 0x425   : > { %v2092_v25 = vpack.c.bf16 %v2067_v56, %v2066_v57 }
 0x426   : > { %v2167_v62 = vpop.f32.mrf.mxu2 }
 0x427   : > { %2196 = vmatmul.bf16.gmra.mxu2 %v2092_v25 }
 0x42e   : > { %v2169_v22 = vpop.f32.mrf.mxu2  ;;  %v2284_v29 = vpop.f32.mrf.mxu3 }
 0x436   : > { %v2172_v4 = vpop.f32.mrf.mxu2  ;;  %v2286_v58 = vpop.f32.mrf.mxu3 }
 0x43e   : > { %v2174_v39 = vpop.f32.mrf.mxu2  ;;  %v2289_v15 = vpop.f32.mrf.mxu3 }
 0x446   : > { %v2177_v45 = vpop.f32.mrf.mxu2  ;;  %v2291_v38 = vpop.f32.mrf.mxu3 }
 0x449   : > { %v1951_v14 = vpop.f32.mrf.mxu0 }
 0x44a   : > { %v2004_v27 = vmin.f32 %v1951_v14, 0.0  ;;  %vm1988_vm1 = vcmp.gt.f32.partialorder %v1951_v14, 0.0 }
 0x44c   : > { %v2034_v40 = vmul.f32 1.442695, %v2004_v27 }
 0x44e   : > { %v2179_v5 = vpop.f32.mrf.mxu2  ;;  %2965 = vpow2.f32 %v2034_v40 }
 0x451   : > { %v1953_v32 = vpop.f32.mrf.mxu0 }
 0x454   : > { %v2966_v30 = vpop.eup %2965 }
 0x455   : > { %v2639_v9 = vadd.f32 -1.0, %v2966_v30 }
 0x456   : > { %v2182_v54 = vpop.f32.mrf.mxu2 }
 0x457   : > { %v2068_v47 = vsel %vm1988_vm1, %v1951_v14, %v2639_v9 }
 0x458   : > { %v1970_v41 = vpop.f32.mrf.mxu1 }
 0x459   : > { %v2005_v28 = vmin.f32 %v1970_v41, 0.0  ;;  %v2264_v51 = vpop.f32.mrf.mxu0  ;;  %vm1989_vm2 = vcmp.gt.f32.partialorder %v1970_v41, 0.0 }
 0x45a   : > { %v2265_v37 = vadd.f32 %v2264_v51, %v2167_v62  ;;  %v2294_v62 = vpop.f32.mrf.mxu3 }
 0x45b   : > { %v2036_v20 = vmul.f32 1.442695, %v2005_v28 }
 0x45c   : > { %v2308_v3 = vadd.f32 %v3774_v16, %v2265_v37 }
 0x45d   : > { %2967 = vpow2.f32 %v2036_v20 }
 0x45e   : > { %2324 = vst [vmem:[%s3777_s29] sm:$0xff] %v2308_v3  ;;  %v2184_v31 = vpop.f32.mrf.mxu2 }
 0x460   : > { %v1972_v61 = vpop.f32.mrf.mxu1 }
 0x461   : > { %v2266_v43 = vpop.f32.mrf.mxu0 }
 0x462   : > { %v2267_v46 = vadd.f32 %v2266_v43, %v2169_v22 }
 0x463   : > { %v2968_v42 = vpop.eup %2967 }
 0x464   : > { %v2640_v19 = vadd.f32 -1.0, %v2968_v42  ;;  %v2309_v26 = vadd.f32 %v3774_v16, %v2267_v46 }
 0x466   : > { %v2069_v13 = vsel %vm1989_vm2, %v1970_v41, %v2640_v19  ;;  %2325 = vst [vmem:[%s3777_s29 + $0x8] sm:$0xff] %v2309_v26 }
 0x467   : > { %v2093_v55 = vpack.c.bf16 %v2069_v13, %v2068_v47 }
 0x469   : > { %v2269_v12 = vpop.f32.mrf.mxu0  ;;  %2201 = vmatmul.bf16.gmra.mxu2 %v2093_v55 }
 0x46a   : > { %v2270_v6 = vadd.f32 %v2269_v12, %v2172_v4  ;;  %v2187_v33 = vpop.f32.mrf.mxu2 }
 0x46b   : > { %v2285_v7 = vadd.f32 %v2284_v29, %v2187_v33 }
 0x46c   : > { %v2310_v1 = vadd.f32 %v3774_v16, %v2270_v6 }
 0x46d   : > { %v2316_v60 = vadd.f32 %v3774_v16, %v2285_v7 }
 0x46e   : > { %2326 = vst [vmem:[%s3777_s29 + $0x10] sm:$0xff] %v2310_v1 }
 0x46f   : > { %2332 = vst [vmem:[%s3777_s29 + $0x40] sm:$0xff] %v2316_v60 }
 0x471   : > { %v2271_v53 = vpop.f32.mrf.mxu0 }
 0x472   : > { %v2272_v23 = vadd.f32 %v2271_v53, %v2174_v39  ;;  %v2189_v63 = vpop.f32.mrf.mxu2 }
 0x473   : > { %v2287_v49 = vadd.f32 %v2286_v58, %v2189_v63 }
 0x474   : > { %v2311_v2 = vadd.f32 %v3774_v16, %v2272_v23 }
 0x475   : > { %v2317_v34 = vadd.f32 %v3774_v16, %v2287_v49 }
 0x476   : > { %2327 = vst [vmem:[%s3777_s29 + $0x18] sm:$0xff] %v2311_v2 }
 0x477   : > { %2333 = vst [vmem:[%s3777_s29 + $0x48] sm:$0xff] %v2317_v34 }
 0x479   : > { %v2274_v10 = vpop.f32.mrf.mxu0 }
 0x47a   : > { %v2275_v50 = vadd.f32 %v2274_v10, %v2177_v45  ;;  %v2296_v45 = vpop.f32.mrf.mxu3 }
 0x47c   : > { %v2312_v8 = vadd.f32 %v3774_v16, %v2275_v50 }
 0x47e   : > { %2328 = vst [vmem:[%s3777_s29 + $0x20] sm:$0xff] %v2312_v8 }
 0x481   : > { %v2276_v24 = vpop.f32.mrf.mxu0 }
 0x482   : > { %v2277_v59 = vadd.f32 %v2276_v24, %v2179_v5  ;;  %v2299_v32 = vpop.f32.mrf.mxu3 }
 0x484   : > { %v2313_v44 = vadd.f32 %v3774_v16, %v2277_v59 }
 0x486   : > { %2329 = vst [vmem:[%s3777_s29 + $0x28] sm:$0xff] %v2313_v44 }
 0x489   : > { %v2279_v17 = vpop.f32.mrf.mxu0 }
 0x48a   : > { %v2280_v35 = vadd.f32 %v2279_v17, %v2182_v54  ;;  %v2301_v28 = vpop.f32.mrf.mxu3 }
 0x48c   : > { %v2314_v0 = vadd.f32 %v3774_v16, %v2280_v35 }
 0x48e   : > { %2330 = vst [vmem:[%s3777_s29 + $0x30] sm:$0xff] %v2314_v0 }
 0x491   : > { %v2281_v52 = vpop.f32.mrf.mxu0 }
 0x492   : > { %v2282_v11 = vadd.f32 %v2281_v52, %v2184_v31 }
 0x494   : > { %v2315_v36 = vadd.f32 %v3774_v16, %v2282_v11  ;;  %v2192_v18 = vpop.f32.mrf.mxu2 }
 0x495   : > { %v2290_v21 = vadd.f32 %v2289_v15, %v2192_v18 }
 0x496   : > { %2331 = vst [vmem:[%s3777_s29 + $0x38] sm:$0xff] %v2315_v36 }
 0x497   : > { %v2318_v48 = vadd.f32 %v3774_v16, %v2290_v21 }
 0x499   : > { %2334 = vst [vmem:[%s3777_s29 + $0x50] sm:$0xff] %v2318_v48 }
 0x49c   : > { %v2194_v56 = vpop.f32.mrf.mxu2 }
 0x49d   : > { %v2292_v57 = vadd.f32 %v2291_v38, %v2194_v56 }
 0x49f   : > { %v2319_v25 = vadd.f32 %v3774_v16, %v2292_v57 }
 0x4a1   : > { %2335 = vst [vmem:[%s3777_s29 + $0x58] sm:$0xff] %v2319_v25 }
 0x4aa   : > { %v2197_v22 = vpop.f32.mrf.mxu2 }
 0x4ab   : > { %v2295_v4 = vadd.f32 %v2294_v62, %v2197_v22 }
 0x4ad   : > { %v2320_v39 = vadd.f32 %v3774_v16, %v2295_v4 }
 0x4af   : > { %2336 = vst [vmem:[%s3777_s29 + $0x60] sm:$0xff] %v2320_v39 }
 0x4b2   : > { %v2199_v14 = vpop.f32.mrf.mxu2 }
 0x4b3   : > { %v2297_v5 = vadd.f32 %v2296_v45, %v2199_v14 }
 0x4b5   : > { %v2321_v27 = vadd.f32 %v3774_v16, %v2297_v5 }
 0x4b7   : > { %2337 = vst [vmem:[%s3777_s29 + $0x68] sm:$0xff] %v2321_v27 }
 0x4ec   : > { %v2202_v40 = vpop.f32.mrf.mxu2 }
 0x4ed   : > { %v2300_v54 = vadd.f32 %v2299_v32, %v2202_v40 }
 0x4ef   : > { %v2322_v41 = vadd.f32 %v3774_v16, %v2300_v54 }
 0x4f1   : > { %2338 = vst [vmem:[%s3777_s29 + $0x70] sm:$0xff] %v2322_v41 }
 0x4f4   : > { %v2204_v51 = vpop.f32.mrf.mxu2 }
 0x4f5   : > { %v2302_v37 = vadd.f32 %v2301_v28, %v2204_v51 }
 0x4f7   : > { %v2323_v20 = vadd.f32 %v3774_v16, %v2302_v37 }
 0x4f9   : > { %2339 = vst [vmem:[%s3777_s29 + $0x78] sm:$0xff] %v2323_v20 }
 0x4fa   : > { %2996 = shalt.err (!%p2993_p4)
}
 0x4fb   : > { %s3033_s16 = smov 128   ;;  %s3034_s29 = smov 8  }
 0x4fc   : > { %2767 = dma.vmem_to_hbm [thread:$0]  (%p3133_p5), %s2354_s15, 2048, %s2356_s22, %s2341_s21, %s3033_s16, %s3033_s16, %s3034_s29  }
 0x4fd PF: > { %p2773_p7 = scmp.ge.s32.totalorder %s3031_s20, 2  ;;  %s2370_s14 = sand.u32 1, %s3019_s17  }
 0x4fe   : > { %s2371_s30 = scalar_lea.sflag [#allocation3], %s2370_s14 }
 0x4ff   : > { %p2770_p8 = pnand %p2773_p7, %p3137_p6 }
 0x501   : > { %p2771_p9 = pneg %p2770_p8 }
 0x503   : > { %3014 = dma.done.wait (%p2771_p9), %s2371_s30, 2048  }
 0x504   : > { %3016 = vsyncadd (%p2771_p9), %s2371_s30, 4294965248  ;;  %s3862_s25 = sld [smem:[#allocation5_spill]]  ;;  %p21_p10 = scmp.ge.s32.totalorder %s3120_s23, 4  }
 0x505   : > { %s3863_s17 = smov %s3023_s18  ;;  %s3864_s18 = smov %s3027_s19 }
 0x506   : > { %s3866_s20 = smov %s3120_s23  ;;  %23 = sbr.rel (!%p21_p10) target bundleno = 3 (0x3), region = 111 }
 0x50a   : > { %s3865_s19 = smov %s3862_s25 }
 0x50b   :  { %2377 = vsyncpa [#allocation3], 1 }
 0x50c   :  { %2379 = vsyncpa [#allocation3 + $0x1], 1 }

</bundles_post_ra>
